<compile_context>
chip_gen: v7x
topology: tpu7x:2x2x1
jax: 0.10.0
libtpu: 0.0.40
codegen_flags: <defaults>
</compile_context>

<pallas_src>
import functools
import math

import jax
import jax.numpy as jnp
from jax.experimental import pallas as pl
from jax.experimental.pallas import tpu as pltpu

F32 = jnp.float32
BF16 = jnp.bfloat16
HIDDEN = 512
NUM_CLASSES = 8
FEAT = 2048


def _vmem_limit_bytes():
    try:
        cap = int(pltpu.get_tpu_info().vmem_capacity_bytes)
    except Exception:
        cap = 128 * 1024 * 1024
    # Leave 25% headroom for compiler scratch / double buffers (48 MiB on v7x).
    return int(min(64 * 1024 * 1024, cap - cap // 4))


_VMEM_LIMIT = _vmem_limit_bytes()


# ---------------------------------------------------------------------------
# matmul + folded-BN affine (+ optional residual, + optional ReLU)
# ---------------------------------------------------------------------------
def _matmul_affine_kernel(a_ref, b_ref, scale_ref, bias_ref, *rest, relu, has_residual):
    if has_residual:
        res_ref, o_ref = rest
    else:
        (o_ref,) = rest
    acc = jnp.dot(a_ref[...], b_ref[...], preferred_element_type=jnp.float32)
    y = acc * scale_ref[...] + bias_ref[...]                     # f32 epilogue
    if has_residual:
        y = y + res_ref[...].astype(jnp.float32)
    if relu:
        y = jnp.maximum(y, 0.0)
    o_ref[...] = y.astype(o_ref.dtype)


def _pick_tile_m(m):
    if m <= 512:
        return m, m                       # single tile, block dim == full dim (no pad)
    for cand in (512, 256, 128):
        if m % cand == 0:
            return cand, m
    return 128, ((m + 127) // 128) * 128  # fallback: pad (not hit at these shapes)


def _pick_tile_n(n):
    if n <= 512:
        return n
    for cand in (512, 256, 128):
        if n % cand == 0:
            return cand
    return n


@functools.partial(jax.jit, static_argnames=("relu",))
def matmul_affine(a, b, scale, bias, residual=None, *, relu=False):
    """relu((a @ b) * scale + bias [+ residual]).  bf16 MXU, f32 accumulate, bf16 out."""
    M, K = a.shape
    N = b.shape[1]
    tm, m_pad = _pick_tile_m(M)
    tn = _pick_tile_n(N)
    a = a.astype(BF16)
    b = b.astype(BF16)
    if m_pad != M:
        a = jnp.pad(a, ((0, m_pad - M), (0, 0)))
        if residual is not None:
            residual = jnp.pad(residual, ((0, m_pad - M), (0, 0)))
    has_res = residual is not None

    in_specs = [
        pl.BlockSpec((tm, K), lambda i, j: (i, 0)),     # A reused across the N axis
        pl.BlockSpec((K, tn), lambda i, j: (0, j)),     # weight tiles stream (pipelined)
        pl.BlockSpec((1, tn), lambda i, j: (0, j)),
        pl.BlockSpec((1, tn), lambda i, j: (0, j)),
    ]
    args = [a, b, scale.reshape(1, N).astype(F32), bias.reshape(1, N).astype(F32)]
    if has_res:
        in_specs.append(pl.BlockSpec((tm, tn), lambda i, j: (i, j)))
        args.append(residual.astype(BF16))

    bytes_accessed = 2 * (a.size + b.size) + 8 * N + 2 * m_pad * N
    if has_res:
        bytes_accessed += 2 * m_pad * N

    out = pl.pallas_call(
        functools.partial(_matmul_affine_kernel, relu=relu, has_residual=has_res),
        out_shape=jax.ShapeDtypeStruct((m_pad, N), BF16),
        grid=(m_pad // tm, N // tn),
        in_specs=in_specs,
        out_specs=pl.BlockSpec((tm, tn), lambda i, j: (i, j)),
        compiler_params=pltpu.CompilerParams(
            dimension_semantics=("parallel", "parallel"),
            vmem_limit_bytes=_VMEM_LIMIT),
        cost_estimate=pl.CostEstimate(flops=2 * m_pad * K * N,
                                      transcendentals=0,
                                      bytes_accessed=int(bytes_accessed)),
    )(*args)
    return out if m_pad == M else out[:M]


# ---------------------------------------------------------------------------
# axis-1 reduction (maxpool patches / general avg-pool)
# ---------------------------------------------------------------------------
def _reduce_axis1_kernel(x_ref, o_ref, *, op):
    x = x_ref[...].astype(jnp.float32)
    r = jnp.max(x, axis=1) if op == "max" else jnp.mean(x, axis=1)
    o_ref[...] = r.astype(o_ref.dtype)


@functools.partial(jax.jit, static_argnames=("op",))
def reduce_axis1(x, *, op):
    """(M, R, C) -> (M, C) reduction over axis 1 ('max' or 'mean')."""
    M, R, C = x.shape
    return pl.pallas_call(
        functools.partial(_reduce_axis1_kernel, op=op),
        out_shape=jax.ShapeDtypeStruct((M, C), x.dtype),
        grid=(1,),
        in_specs=[pl.BlockSpec((M, R, C), lambda i: (0, 0, 0))],
        out_specs=pl.BlockSpec((M, C), lambda i: (0, 0)),
        compiler_params=pltpu.CompilerParams(
            dimension_semantics=("arbitrary",), vmem_limit_bytes=_VMEM_LIMIT),
    )(x)


# ---------------------------------------------------------------------------
# player-max pool fused with LSTM input projection
# ---------------------------------------------------------------------------
def _pool_matmul_kernel(x_ref, w_ref, b_ref, o_ref):
    xm = jnp.max(x_ref[...].astype(jnp.float32), axis=1).astype(jnp.bfloat16)
    o_ref[...] = (jnp.dot(xm, w_ref[...], preferred_element_type=jnp.float32)
                  + b_ref[...])


@jax.jit
def pool_matmul(x, w, bias):
    """x:(B,P,K) -> max over P -> @ w:(K,N) + bias.  Returns f32 (B,N)."""
    B, P, K = x.shape
    N = w.shape[1]
    tn = _pick_tile_n(N)
    return pl.pallas_call(
        _pool_matmul_kernel,
        out_shape=jax.ShapeDtypeStruct((B, N), F32),
        grid=(N // tn,),
        in_specs=[pl.BlockSpec((B, P, K), lambda j: (0, 0, 0)),
                  pl.BlockSpec((K, tn), lambda j: (0, j)),
                  pl.BlockSpec((1, tn), lambda j: (0, j))],
        out_specs=pl.BlockSpec((B, tn), lambda j: (0, j)),
        compiler_params=pltpu.CompilerParams(
            dimension_semantics=("parallel",), vmem_limit_bytes=_VMEM_LIMIT),
        cost_estimate=pl.CostEstimate(flops=2 * B * K * N, transcendentals=0,
                                      bytes_accessed=int(2 * (B * P * K + K * N) + 4 * (N + B * N))),
    )(x.astype(BF16), w.astype(BF16), bias.reshape(1, N).astype(F32))


# ---------------------------------------------------------------------------
# LSTM recurrence (returns h_T == lstm_out[:, -1, :])
# ---------------------------------------------------------------------------
def _lstm_kernel(xg_ref, whh_ref, o_ref, h_ref, c_ref, *, hidden):
    t = pl.program_id(0)

    @pl.when(t == 0)
    def _():
        h_ref[...] = jnp.zeros_like(h_ref)
        c_ref[...] = jnp.zeros_like(c_ref)

    # PyTorch gate order i, f, g, o.  xg already holds x_t @ W_ih^T + b_ih + b_hh.
    gates = xg_ref[0] + jnp.dot(h_ref[...].astype(jnp.bfloat16), whh_ref[...],
                                preferred_element_type=jnp.float32)
    i = jax.nn.sigmoid(gates[:, 0 * hidden:1 * hidden])
    f = jax.nn.sigmoid(gates[:, 1 * hidden:2 * hidden])
    g = jnp.tanh(gates[:, 2 * hidden:3 * hidden])
    o = jax.nn.sigmoid(gates[:, 3 * hidden:4 * hidden])
    c = f * c_ref[...] + i * g
    h = o * jnp.tanh(c)
    c_ref[...] = c
    h_ref[...] = h

    @pl.when(t == pl.num_programs(0) - 1)
    def _():
        o_ref[...] = h


@jax.jit
def lstm_last(xg, whh_t):
    """xg: (seq, batch, 4H) f32 pre-projected inputs.  whh_t: (H, 4H) bf16."""
    seq, batch, four_h = xg.shape
    hidden = four_h // 4
    return pl.pallas_call(
        functools.partial(_lstm_kernel, hidden=hidden),
        out_shape=jax.ShapeDtypeStruct((batch, hidden), F32),
        grid=(seq,),
        in_specs=[
            pl.BlockSpec((1, batch, four_h), lambda t: (t, 0, 0)),
            pl.BlockSpec((hidden, four_h), lambda t: (0, 0)),
        ],
        out_specs=pl.BlockSpec((batch, hidden), lambda t: (0, 0)),
        scratch_shapes=[pltpu.VMEM((batch, hidden), F32),
                        pltpu.VMEM((batch, hidden), F32)],
        compiler_params=pltpu.CompilerParams(
            dimension_semantics=("arbitrary",), vmem_limit_bytes=_VMEM_LIMIT),
    )(xg.astype(F32), whh_t.astype(BF16))


# ---------------------------------------------------------------------------
# FC head: Linear(512,256) + LayerNorm + GELU + Dropout(id) + Linear(256,8)
# ---------------------------------------------------------------------------
_SQRT_2 = math.sqrt(2.0)


def _erf(z):
    # Abramowitz & Stegun 7.1.26 rational approximation (|err| < 1.5e-7).
    # TODO(synk): Mosaic has no native erf; exact-GELU erf is approximated in-kernel.
    a1, a2, a3, a4, a5 = 0.254829592, -0.284496736, 1.421413741, -1.453152027, 1.061405429
    p = 0.3275911
    s = jnp.where(z >= 0.0, 1.0, -1.0)
    x = jnp.abs(z)
    t = 1.0 / (1.0 + p * x)
    poly = ((((a5 * t + a4) * t + a3) * t + a2) * t + a1) * t
    return s * (1.0 - poly * jnp.exp(-x * x))


def _head_kernel(x_ref, w1_ref, b1_ref, g_ref, beta_ref, w2_ref, b2_ref, o_ref):
    h = (jnp.dot(x_ref[...].astype(jnp.bfloat16), w1_ref[...],
                 preferred_element_type=jnp.float32) + b1_ref[...])
    mu = jnp.mean(h, axis=-1, keepdims=True)
    var = jnp.mean((h - mu) ** 2, axis=-1, keepdims=True)
    hn = (h - mu) * jax.lax.rsqrt(var + 1e-5) * g_ref[...] + beta_ref[...]
    act = 0.5 * hn * (1.0 + _erf(hn / _SQRT_2))          # exact (erf-form) GELU
    # nn.Dropout(0.3) is identity in eval/inference mode.
    o_ref[...] = (jnp.dot(act.astype(jnp.bfloat16), w2_ref[...],
                          preferred_element_type=jnp.float32) + b2_ref[...])


@jax.jit
def fc_head(x, w1, b1, gamma, beta, w2, b2):
    batch, d_in = x.shape
    d_mid, d_out = w1.shape[1], w2.shape[1]
    return pl.pallas_call(
        _head_kernel,
        out_shape=jax.ShapeDtypeStruct((batch, d_out), F32),
        grid=(1,),
        in_specs=[
            pl.BlockSpec((batch, d_in), lambda i: (0, 0)),
            pl.BlockSpec((d_in, d_mid), lambda i: (0, 0)),
            pl.BlockSpec((1, d_mid), lambda i: (0, 0)),
            pl.BlockSpec((1, d_mid), lambda i: (0, 0)),
            pl.BlockSpec((1, d_mid), lambda i: (0, 0)),
            pl.BlockSpec((d_mid, d_out), lambda i: (0, 0)),
            pl.BlockSpec((1, d_out), lambda i: (0, 0)),
        ],
        out_specs=pl.BlockSpec((batch, d_out), lambda i: (0, 0)),
        compiler_params=pltpu.CompilerParams(
            dimension_semantics=("arbitrary",), vmem_limit_bytes=_VMEM_LIMIT),
    )(x.astype(F32), w1.astype(BF16), b1.reshape(1, -1).astype(F32),
      gamma.reshape(1, -1).astype(F32), beta.reshape(1, -1).astype(F32),
      w2.astype(BF16), b2.reshape(1, -1).astype(F32))


# ---------------------------------------------------------------------------
# ResNet-50 backbone (frozen, eval mode) — convs as im2col + Pallas matmul
# ---------------------------------------------------------------------------
def _im2col(x, kh, kw, stride, padding, pad_value=0.0):
    """x: NHWC -> (N*Hout*Wout, kh*kw*C) patches (channel fastest)."""
    n, h, w, c = x.shape
    if padding:
        x = jnp.pad(x, ((0, 0), (padding, padding), (padding, padding), (0, 0)),
                    constant_values=pad_value)
    hout = (h + 2 * padding - kh) // stride + 1
    wout = (w + 2 * padding - kw) // stride + 1
    cols = []
    for di in range(kh):
        for dj in range(kw):
            cols.append(x[:, di:di + hout * stride:stride,
                          dj:dj + wout * stride:stride, :])
    patches = jnp.stack(cols, axis=3)                    # (n, hout, wout, kh*kw, c)
    return patches.reshape(n * hout * wout, kh * kw * c), hout, wout


def conv_bn(x, p, stride, padding, relu, residual=None):
    """Conv2d(bias=False) + folded eval-mode BatchNorm2d (+ residual, + ReLU)."""
    w = p["w"]                                           # HWIO, bf16
    kh, kw, cin, cout = w.shape
    n = x.shape[0]
    if kh == 1 and kw == 1 and padding == 0:
        if stride != 1:
            x = x[:, ::stride, ::stride, :]
        hout, wout = x.shape[1], x.shape[2]
        patches = x.reshape(n * hout * wout, cin)
    else:
        patches, hout, wout = _im2col(x, kh, kw, stride, padding)
    y = matmul_affine(patches, w.reshape(kh * kw * cin, cout),
                      p["scale"], p["bias"], residual, relu=relu)
    return y.reshape(n, hout, wout, cout)


def maxpool_3x3_s2(x):
    n, h, w, c = x.shape
    # TODO(synk): could avoid the 9x patch expansion with an in-kernel shifted-slab max;
    # kept as bf16 im2col + Pallas reduce for lowering robustness (~0.9 MB at this size).
    patches, hout, wout = _im2col(x, 3, 3, 2, 1, pad_value=-jnp.inf)
    y = reduce_axis1(patches.reshape(n * hout * wout, 9, c), op="max")
    return y.reshape(n, hout, wout, c)


def bottleneck(x, p, stride):
    out = conv_bn(x, p["conv1"], 1, 0, relu=True)
    out = conv_bn(out, p["conv2"], stride, 1, relu=True)
    if "down" in p:
        identity = conv_bn(x, p["down"], stride, 0, relu=False)
    else:
        identity = x
    ih, iw = identity.shape[1], identity.shape[2]
    res2d = identity.reshape(identity.shape[0] * ih * iw, identity.shape[3])
    # Residual add + ReLU fused into the conv3 matmul epilogue.
    return conv_bn(out, p["conv3"], 1, 0, relu=True, residual=res2d)


_RESNET50_STAGES = ((3, 64, 1), (4, 128, 2), (6, 256, 2), (3, 512, 2))


def resnet50_forward(x_nhwc, params):
    x = conv_bn(x_nhwc, params["conv1"], 2, 3, relu=True)
    x = maxpool_3x3_s2(x)
    for (nblocks, _planes, stride), layer in zip(_RESNET50_STAGES, params["layers"]):
        for b, bp in enumerate(layer):
            x = bottleneck(x, bp, stride if b == 0 else 1)
    n, h, w, c = x.shape
    if h * w == 1:                       # AdaptiveAvgPool2d((1,1)) degenerates to a copy
        return x.reshape(n, c)
    return reduce_axis1(x.reshape(n, h * w, c), op="mean")


# ---------------------------------------------------------------------------
# Deterministic synthetic parameters (shapes match the PyTorch module's __init__)
# ---------------------------------------------------------------------------
class _KeyGen:
    def __init__(self, key):
        self._key = key

    def __call__(self):
        self._key, sub = jax.random.split(self._key)
        return sub


def _init_conv_bn(kg, kh, kw, cin, cout):
    std = math.sqrt(2.0 / (kh * kw * cin))
    w = (std * jax.random.normal(kg(), (kh, kw, cin, cout), F32)).astype(BF16)
    gamma = 1.0 + 0.01 * jax.random.normal(kg(), (cout,), F32)
    beta = 0.01 * jax.random.normal(kg(), (cout,), F32)
    running_mean = 0.01 * jax.random.normal(kg(), (cout,), F32)
    running_var = 1.0 + 0.01 * jnp.abs(jax.random.normal(kg(), (cout,), F32))
    scale = gamma / jnp.sqrt(running_var + 1e-5)   # eval-mode BN folded into affine
    bias = beta - running_mean * scale
    return {"w": w, "scale": scale, "bias": bias}


def _init_bottleneck(kg, cin, planes, stride):
    p = {"conv1": _init_conv_bn(kg, 1, 1, cin, planes),
         "conv2": _init_conv_bn(kg, 3, 3, planes, planes),
         "conv3": _init_conv_bn(kg, 1, 1, planes, 4 * planes)}
    if stride != 1 or cin != 4 * planes:
        p["down"] = _init_conv_bn(kg, 1, 1, cin, 4 * planes)
    return p


def _init_linear(kg, fan_in, fan_out):
    k = 1.0 / math.sqrt(fan_in)
    w = jax.random.uniform(kg(), (fan_in, fan_out), F32, -k, k)
    b = jax.random.uniform(kg(), (fan_out,), F32, -k, k)
    return w, b


def init_params(key):
    kg = _KeyGen(key)
    resnet = {"conv1": _init_conv_bn(kg, 7, 7, 3, 64), "layers": []}
    cin = 64
    for nblocks, planes, stride in _RESNET50_STAGES:
        layer = []
        for b in range(nblocks):
            layer.append(_init_bottleneck(kg, cin, planes, stride if b == 0 else 1))
            cin = 4 * planes
        resnet["layers"].append(layer)

    k = 1.0 / math.sqrt(HIDDEN)
    lstm = {
        "w_ih_t": jax.random.uniform(kg(), (FEAT, 4 * HIDDEN), F32, -k, k).astype(BF16),
        "w_hh_t": jax.random.uniform(kg(), (HIDDEN, 4 * HIDDEN), F32, -k, k).astype(BF16),
        "bias": (jax.random.uniform(kg(), (4 * HIDDEN,), F32, -k, k)
                 + jax.random.uniform(kg(), (4 * HIDDEN,), F32, -k, k)),  # b_ih + b_hh
    }
    w1, b1 = _init_linear(kg, HIDDEN, 256)
    w2, b2 = _init_linear(kg, 256, NUM_CLASSES)
    head = {"w1": w1.astype(BF16), "b1": b1, "gamma": jnp.ones((256,), F32),
            "beta": jnp.zeros((256,), F32), "w2": w2.astype(BF16), "b2": b2}
    return {"resnet": resnet, "lstm": lstm, "head": head}


# ---------------------------------------------------------------------------
# Full forward pass
# ---------------------------------------------------------------------------
def group_activity_classifier_forward(x, params):
    """x: (batch, seq, num_players, c, h, w), NCHW images (PyTorch convention)."""
    b, s, p, c, h, w = x.shape
    imgs = jnp.transpose(x.reshape(b * s * p, c, h, w), (0, 2, 3, 1)).astype(BF16)
    feats = resnet50_forward(imgs, params["resnet"])                 # (b*s*p, 2048) bf16
    feats = feats.reshape(b * s, p, FEAT)
    lstm = params["lstm"]
    # nn.AdaptiveMaxPool2d((1, 2048)) == max over players, fused with the LSTM
    # input projection x_t @ W_ih^T + (b_ih + b_hh).
    xg = pool_matmul(feats, lstm["w_ih_t"], lstm["bias"])            # (b*s, 4H) f32
    xg = xg.reshape(b, s, 4 * HIDDEN).transpose(1, 0, 2)             # (seq, batch, 4H)
    h_last = lstm_last(xg, lstm["w_hh_t"])                           # == lstm_out[:, -1, :]
    hd = params["head"]
    return fc_head(h_last, hd["w1"], hd["b1"], hd["gamma"], hd["beta"],
                   hd["w2"], hd["b2"])


if __name__ == "__main__":
    root = jax.random.PRNGKey(0)
    x_key, param_key = jax.random.split(root)
    # Small shapes consistent with the module: batch=2, seq=3, players=2,
    # 3x32x32 images (32 = minimum spatial size for ResNet-50's stride of 32).
    x = jax.random.normal(x_key, (2, 3, 2, 3, 32, 32), F32)
    params = init_params(param_key)
    fwd = jax.jit(group_activity_classifier_forward)
    logits = jax.block_until_ready(fwd(x, params))
    assert logits.shape == (2, NUM_CLASSES)
    assert bool(jnp.all(jnp.isfinite(logits)))
    print("KERNEL_OK")
</pallas_src>

<mosaic_0001>
module attributes {stable_mosaic.version = 11 : i64} {
  func.func @_matmul_affine_kernel(%arg0: i32, %arg1: i32, %arg2: memref<512x147xbf16, #tpu.memory_space<vmem>>, %arg3: memref<147x64xbf16, #tpu.memory_space<vmem>>, %arg4: memref<1x64xf32, #tpu.memory_space<vmem>>, %arg5: memref<1x64xf32, #tpu.memory_space<vmem>>, %arg6: memref<512x64xbf16, #tpu.memory_space<vmem>>) attributes {dimension_semantics = [#tpu.dimension_semantics<parallel>, #tpu.dimension_semantics<parallel>], iteration_bounds = array<i64: 6, 1>, scalar_prefetch = 0 : i64, scratch_operands = 0 : i64, tpu.core_type = #tpu.core_type<tc>, window_params = [{transform_indices = @transform_0, window_bounds = array<i64: 512, 147>}, {transform_indices = @transform_1, window_bounds = array<i64: 147, 64>}, {transform_indices = @transform_2, window_bounds = array<i64: 1, 64>}, {transform_indices = @transform_3, window_bounds = array<i64: 1, 64>}, {transform_indices = @transform_4, window_bounds = array<i64: 512, 64>}]} {
    %c0 = arith.constant 0 : index
    %c0_0 = arith.constant 0 : index
    %0 = vector.load %arg2[%c0, %c0_0] : memref<512x147xbf16, #tpu.memory_space<vmem>>, vector<512x147xbf16>
    %c0_1 = arith.constant 0 : index
    %c0_2 = arith.constant 0 : index
    %1 = vector.load %arg3[%c0_1, %c0_2] : memref<147x64xbf16, #tpu.memory_space<vmem>>, vector<147x64xbf16>
    %cst = arith.constant dense<0.000000e+00> : vector<512x64xf32>
    %2 = tpu.matmul %0, %1, %cst {dimension_numbers = #tpu.dot_dimension_numbers<[1], [0], [0], [1], [0, 0, 1, 1], [], []>} : vector<512x147xbf16>, vector<147x64xbf16>, vector<512x64xf32> -> vector<512x64xf32>
    %c0_3 = arith.constant 0 : index
    %c0_4 = arith.constant 0 : index
    %3 = vector.load %arg4[%c0_3, %c0_4] : memref<1x64xf32, #tpu.memory_space<vmem>>, vector<1x64xf32>
    %4 = vector.broadcast %3 : vector<1x64xf32> to vector<512x64xf32>
    %5 = arith.mulf %2, %4 : vector<512x64xf32>
    %c0_5 = arith.constant 0 : index
    %c0_6 = arith.constant 0 : index
    %6 = vector.load %arg5[%c0_5, %c0_6] : memref<1x64xf32, #tpu.memory_space<vmem>>, vector<1x64xf32>
    %7 = vector.broadcast %6 : vector<1x64xf32> to vector<512x64xf32>
    %8 = arith.addf %5, %7 : vector<512x64xf32>
    %cst_7 = arith.constant 0.000000e+00 : f32
    %9 = vector.broadcast %cst_7 : f32 to vector<512x64xf32>
    %10 = arith.maximumf %8, %9 : vector<512x64xf32>
    %11 = arith.truncf %10 : vector<512x64xf32> to vector<512x64xbf16>
    %c0_8 = arith.constant 0 : index
    %c0_9 = arith.constant 0 : index
    %12 = vector.load %arg6[%c0_8, %c0_9] : memref<512x64xbf16, #tpu.memory_space<vmem>>, vector<512x64xbf16>
    tpu.vector_store %arg6[%c0_8, %c0_9], %11 {strides = array<i32>} : memref<512x64xbf16, #tpu.memory_space<vmem>>, vector<512x64xbf16>,
    return
  }
  func.func @transform_0(%arg0: i32, %arg1: i32) -> (i32, i32) {
    %c0_i32 = arith.constant 0 : i32
    %c0_i32_0 = arith.constant 0 : i32
    return %arg0, %c0_i32 : i32, i32
  }
  func.func @transform_1(%arg0: i32, %arg1: i32) -> (i32, i32) {
    %c0_i32 = arith.constant 0 : i32
    %c0_i32_0 = arith.constant 0 : i32
    return %c0_i32, %arg1 : i32, i32
  }
  func.func @transform_2(%arg0: i32, %arg1: i32) -> (i32, i32) {
    %c0_i32 = arith.constant 0 : i32
    %c0_i32_0 = arith.constant 0 : i32
    return %c0_i32, %arg1 : i32, i32
  }
  func.func @transform_3(%arg0: i32, %arg1: i32) -> (i32, i32) {
    %c0_i32 = arith.constant 0 : i32
    %c0_i32_0 = arith.constant 0 : i32
    return %c0_i32, %arg1 : i32, i32
  }
  func.func @transform_4(%arg0: i32, %arg1: i32) -> (i32, i32) {
    %c0_i32 = arith.constant 0 : i32
    return %arg0, %arg1 : i32, i32
  }
}

</mosaic_0001>

<bundles_post_ra>
// kernel: matmul_affine.1
= control target key start
LH: loop header
LB: loop body
LE: loop exit
PB: predicated region body
PF: predicated region fallthrough
CT: control target
= control target key end

     0   :  { %9 = vsyncpa [#allocation3], 0  ;;  %s3149_s0 = inlined_call_operand.hbm [shape: bf16[3072,147], index: 0, kind: input, shape index: {}]   ;;  %s3150_s1 = inlined_call_operand.hbm [shape: bf16[147,64], index: 1, kind: input, shape index: {}]   ;;  %s3151_s2 = inlined_call_operand.hbm [shape: f32[1,64], index: 2, kind: input, shape index: {}]   ;;  %s3152_s3 = inlined_call_operand.hbm [shape: f32[1,64], index: 3, kind: input, shape index: {}]   ;;  %s3153_s4 = inlined_call_operand.hbm [shape: bf16[3072,64], index: 4, kind: output, shape index: {}]  }
   0x1   :  { %11 = vsyncpa [#allocation3 + $0x1], 0 }
   0x2   :  { %12 = vsyncpa [#allocation6], 0 }
   0x3   :  { %13 = vsyncpa [#allocation9], 0 }
   0x4   :  { %14 = vsyncpa [#allocation4], 0 }
   0x5   :  { %16 = vsyncpa [#allocation4 + $0x1], 0  ;;  %s2508_s15 = smov 0   ;;  %s2510_s16 = smov 0  }
   0x6   :  { %s2512_s17 = smov 0   ;;  %s2514_s18 = smov 0  }
   0x7   :  { %s2516_s19 = smov 0   ;;  %s2518_s20 = smov 0  }
   0x8 LB: > { %s1776_s21 = sadd.s32 4294967295, %s2468_s20   ;;  %s1777_s22 = sadd.s32 4294967294, %s2468_s20   ;;  %s2468_s20 = sphi %s2518_s20, %s22_s20   ;;  %s2464_s19 = sphi %s2516_s19, %s3179_s19   ;;  %s2460_s18 = sphi %s2514_s18, %s3178_s18   ;;  %s2456_s17 = sphi %s2512_s17, %s3177_s17   ;;  %s2452_s16 = sphi %s2510_s16, %s3176_s16   ;;  %s2448_s15 = sphi %s2508_s15, %s3175_s15  }
   0x9   : > { %p54_p0 = scmp.ne.s32.totalorder %s2452_s16, %s2448_s15  ;;  %p2542_p1 = scmp.eq.s32.totalorder %s1776_s21, 0 }
   0xa   : > { %p2546_p2 = scmp.eq.s32.totalorder %s1776_s21, 5  ;;  %p164_p3 = scmp.eq.s32.totalorder %s1777_s22, 5 }
   0xb   : > { %s3159_s23 = scalar_select %p2542_p1, 1, 0 }
   0xc   : > { %s3160_s24 = scalar_select %p2546_p2, 1, 0 }
   0xd   : > { %p2552_p4 = por %p2542_p1, %p54_p0  ;;  %p1778_p5 = scmp.ge.s32.totalorder %s2468_s20, 1 }
   0xe   : > { %p2557_p6 = por %p164_p3, %p54_p0  ;;  %p171_p7 = scmp.lt.s32.totalorder %s2468_s20, 7 }
   0xf   : > { %s3161_s25 = scalar_select %p2552_p4, 1, 0 }
  0x10   : > { %s3162_s26 = scalar_select %p2557_p6, 1, 0 }
  0x11   : > { %p2562_p8 = pnand %p1778_p5, %p171_p7  ;;  %s2470_s28 = smov [#allocation5]  }
  0x12   : > { %3163 = sst [smem:[#allocation15_spill]] %s3162_s26  ;;  %s185_s29 = sshll.u32 %s2470_s28, 4  ;;  %s2566_s29 = int_to_ptr.vmem [resolvable:$true] %s185_s29 }
  0x13   : > { %s3164_s27 = scalar_select %p2562_p8, 1, 0 }
  0x14   : > { %p2073_p9 = pneg %p2562_p8  ;;  %s2471_s5 = smov [#allocation7]  }
  0x15   : > { %s201_s6 = sshll.u32 %s2471_s5, 4  ;;  %s2472_s7 = smov [#allocation8]   ;;  %s2576_s6 = int_to_ptr.vmem [resolvable:$true] %s201_s6 }
  0x16   : > { %p2572_p10 = pnand %p2073_p9, %p2542_p1  ;;  %s2578_s8 = sshll.u32 %s2472_s7, 4  ;;  %s215_s8 = int_to_ptr.vmem [resolvable:$true] %s2578_s8 }
  0x17   : > { %s2264_s11 = scalar_lea.hbm %s3150_s1, 1216 }
  0x18   : > { %p2265_p11 = scmp.ne.s32.totalorder %s3150_s1, %s2264_s11  ;;  %p2588_p12 = pneg %p2572_p10 }
  0x19   : > { %p2271_p3 = scmp.lt.u32.totalorder %s2264_s11, %s3150_s1 }
  0x1a   : > { %p2267_p13 = pnand %p2588_p12, %p2265_p11 }
  0x1c   : > { %p2268_p0 = pneg %p2267_p13 }
  0x1e   : > { %p2273_p5 = pnand %p2271_p3, %p2268_p0 }
  0x20   : > { %2276 = shalt.err (!%p2273_p5)
}
  0x21   : > { %s2277_s28 = scalar_lea.vmem %s2566_s29, 1216  ;;  %p2285_p1 = scmp.lt.s32.totalorder %s2566_s29, %s2566_s29 }
  0x22   : > { %p2278_p7 = scmp.ne.s32.totalorder %s2566_s29, %s2277_s28  ;;  %p2286_p4 = scmp.lt.s32.totalorder %s2277_s28, %s2277_s28 }
  0x24   : > { %p2280_p9 = pnand %p2278_p7, %p2588_p12  ;;  %p2287_p11 = por %p2286_p4, %p2285_p1 }
  0x26   : > { %p2281_p6 = pneg %p2280_p9 }
  0x28   : > { %p2288_p13 = pnand %p2287_p11, %p2281_p6 }
  0x2a   : > { %2291 = shalt.err (!%p2288_p13)
}
  0x2b   : > { %s2473_s5 = smov 64   ;;  %s2474_s7 = smov 4  }
  0x2c   : > { %2076 = dma.hbm_to_vmem [thread:$0]  (!%p2572_p10), %s3150_s1, 1216, %s2566_s29, [#allocation6], %s2473_s5, %s2473_s5, %s2474_s7  }
  0x2d   : > { %s2292_s13 = scalar_lea.hbm %s3151_s2, 16 }
  0x2e   : > { %p2293_p1 = scmp.ne.s32.totalorder %s3151_s2, %s2292_s13  ;;  %p2299_p0 = scmp.lt.u32.totalorder %s2292_s13, %s3151_s2 }
  0x30   : > { %p2295_p4 = pnand %p2293_p1, %p2588_p12 }
  0x32   : > { %p2296_p6 = pneg %p2295_p4 }
  0x34   : > { %p2301_p3 = pnand %p2299_p0, %p2296_p6 }
  0x36   : > { %2304 = shalt.err (!%p2301_p3)
}
  0x37   : > { %s2305_s29 = scalar_lea.vmem %s2576_s6, 16  ;;  %s2312_s5 = scalar_lea.vmem %s2576_s6, 32 }
  0x38   : > { %p2306_p5 = scmp.ne.s32.totalorder %s2576_s6, %s2305_s29  ;;  %p2313_p11 = scmp.lt.s32.totalorder %s2576_s6, %s2576_s6 }
  0x39   : > { %p2314_p13 = scmp.lt.s32.totalorder %s2312_s5, %s2305_s29 }
  0x3a   : > { %p2308_p7 = pnand %p2306_p5, %p2588_p12 }
  0x3b   : > { %p2315_p1 = por %p2314_p13, %p2313_p11 }
  0x3c   : > { %p2309_p9 = pneg %p2308_p7 }
  0x3e   : > { %p2316_p4 = pnand %p2315_p1, %p2309_p9 }
  0x40   : > { %2319 = shalt.err (!%p2316_p4)
}
  0x41   : > { %2079 = dma.hbm_to_vmem [thread:$0]  (!%p2572_p10), %s3151_s2, 16, %s2576_s6, [#allocation6]  }
  0x42   : > { %s2320_s11 = scalar_lea.hbm %s3152_s3, 16 }
  0x43   : > { %p2321_p6 = scmp.ne.s32.totalorder %s3152_s3, %s2320_s11  ;;  %p2327_p5 = scmp.lt.u32.totalorder %s2320_s11, %s3152_s3 }
  0x45   : > { %p2323_p0 = pnand %p2321_p6, %p2588_p12 }
  0x47   : > { %p2324_p3 = pneg %p2323_p0 }
  0x49   : > { %p2329_p7 = pnand %p2327_p5, %p2324_p3 }
  0x4b   : > { %2332 = shalt.err (!%p2329_p7)
}
  0x4c   : > { %s2333_s28 = scalar_lea.vmem %s215_s8, 16  ;;  %s2340_s6 = scalar_lea.vmem %s215_s8, 32 }
  0x4d   : > { %p2334_p9 = scmp.ne.s32.totalorder %s215_s8, %s2333_s28  ;;  %p2341_p1 = scmp.lt.s32.totalorder %s215_s8, %s215_s8 }
  0x4e   : > { %p2342_p4 = scmp.lt.s32.totalorder %s2340_s6, %s2333_s28 }
  0x4f   : > { %p2336_p11 = pnand %p2334_p9, %p2588_p12 }
  0x50   : > { %p2343_p8 = por %p2342_p4, %p2341_p1 }
  0x51   : > { %p2337_p13 = pneg %p2336_p11 }
  0x53   : > { %p2344_p2 = pnand %p2343_p8, %p2337_p13 }
  0x55   : > { %2347 = shalt.err (!%p2344_p2)
}
  0x56   : > { %2082 = dma.hbm_to_vmem [thread:$0]  (!%p2572_p10), %s3152_s3, 16, %s215_s8, [#allocation9]  }
  0x57   : > { %s41_s14 = sadd.s32 1, %s2456_s17  ;;  %s34_s26 = sadd.s32 1, %s2464_s19 }
  0x58   : > { %p48_p2 = scmp.ne.s32.totalorder %s2456_s17, %s2452_s16  ;;  %p36_p8 = scmp.ge.s32.totalorder %s34_s26, 6 }
  0x59   : > { %p49_p12 = scmp.eq.s32.totalorder %s2468_s20, 0  ;;  %p3167_p6 = scmp.ne.s32.totalorder %s3160_s24, 0 }
  0x5a   : > { %p2094_p3 = scmp.lt.s32.totalorder %s2468_s20, 6  ;;  %s3181_s26 = smov (%p36_p8, %s34_s26), 0 }
  0x5b   : > { %p2659_p0 = por %p3167_p6, %p48_p2  ;;  %p50_p5 = por %p49_p12, %p48_p2 }
  0x5c   : > { %s225_s7 = sand.u32 1, %s2456_s17   ;;  %s38_s9 = ssub.s32 %s2464_s19, %s3181_s26 }
  0x5d   : > { %p39_p7 = scmp.eq.s32.totalorder %s38_s9, 0  ;;  %s1783_s8 = sshll.u32 %s225_s7, 9 }
  0x5e   : > { %s1971_s10 = sshll.u32 %s2464_s19, 13  ;;  %s229_s21 = scalar_lea.vmem [#allocation2], %s1783_s8 }
  0x5f   : > { %s2671_s11 = scalar_select %p39_p7, %s2456_s17, %s41_s14  }
  0x60   : > { %s2676_s24 = scalar_lea.hbm %s3149_s0, %s1971_s10  ;;  %s237_s22 = sshll.u32 %s229_s21, 4  ;;  %s2678_s22 = int_to_ptr.vmem [resolvable:$true] %s237_s22 }
  0x61   : > { %p2682_p10 = pnand %p2094_p3, %p50_p5  ;;  %s2686_s6 = scalar_lea.sflag [#allocation3], %s225_s7 }
  0x62   : > { %s2348_s29 = scalar_lea.hbm %s2676_s24, 8192  ;;  %s2353_s9 = scalar_lea.hbm %s3149_s0, 49152 }
  0x63   : > { %p2349_p9 = scmp.ne.s32.totalorder %s2676_s24, %s2348_s29  ;;  %p2350_p11 = pneg %p2682_p10 }
  0x64   : > { %p2354_p4 = scmp.lt.u32.totalorder %s2676_s24, %s3149_s0  ;;  %p2355_p2 = scmp.lt.u32.totalorder %s2353_s9, %s2348_s29 }
  0x65   : > { %p2351_p13 = pnand %p2350_p11, %p2349_p9  ;;  %p2357_p12 = scmp.lt.u32.totalorder %s2348_s29, %s2676_s24 }
  0x66   : > { %p2356_p8 = por %p2355_p2, %p2354_p4 }
  0x67   : > { %p2352_p1 = pneg %p2351_p13 }
  0x68   : > { %p2358_p6 = por %p2357_p12, %p2356_p8 }
  0x6a   : > { %p2359_p3 = pnand %p2358_p6, %p2352_p1 }
  0x6c   : > { %2362 = shalt.err (!%p2359_p3)
}
  0x6d   : > { %s2363_s7 = scalar_lea.vmem %s2678_s22, 8192  ;;  %s2475_s12 = smov [#allocation2]  }
  0x6e   : > { %p2364_p5 = scmp.ne.s32.totalorder %s2678_s22, %s2363_s7  ;;  %s2368_s13 = sshll.u32 %s2475_s12, 4  ;;  %s2369_s13 = int_to_ptr.vmem [resolvable:$false] %s2368_s13 }
  0x6f   : > { %s2370_s21 = scalar_lea.vmem %s2369_s13, 16384  ;;  %p2371_p13 = scmp.lt.s32.totalorder %s2678_s22, %s2369_s13 }
  0x70   : > { %p2366_p7 = pnand %p2364_p5, %p2350_p11  ;;  %p2372_p4 = scmp.lt.s32.totalorder %s2370_s21, %s2363_s7 }
  0x72   : > { %p2367_p9 = pneg %p2366_p7  ;;  %p2373_p2 = por %p2372_p4, %p2371_p13 }
  0x74   : > { %p2374_p8 = pnand %p2373_p2, %p2367_p9 }
  0x76   : > { %2377 = shalt.err (!%p2374_p8)
}
  0x77   : > { %s2476_s29 = smov 128   ;;  %s2477_s5 = smov 8  }
  0x78   : > { %2086 = dma.hbm_to_vmem [thread:$0]  (!%p2682_p10), %s2676_s24, 8192, %s2678_s22, %s2686_s6, %s2476_s29, %s2476_s29, %s2477_s5  }
  0x79   : > { %p3170_p11 = scmp.ne.s32.totalorder %s3164_s27, 0 }
  0x7a   : > { %s2717_s14 = sand.u32 (!%p3170_p11), 1, %s2452_s16   ;;  %p3171_p1 = scmp.ne.s32.totalorder (!%p3170_p11), %s3161_s25, 0 }
  0x7b   : > { %249 = sbr.rel (%p3170_p11) target bundleno = 534 (0x216), region = 36  ;;  %s1788_s9 = sshll.u32 (!%p3170_p11), %s2717_s14, 9 }
  0x7c   : > { %s252_s8 = scalar_lea.sflag (!%p3170_p11), [#allocation3], %s2717_s14  ;;  %s2721_s10 = scalar_lea.vmem (!%p3170_p11), [#allocation2], %s1788_s9 }
  0x82   : > { %2431 = dma.done.wait (%p3171_p1), %s252_s8, 8192  }
  0x83   : > { %2433 = vsyncadd (%p3171_p1), %s252_s8, 4294959104  ;;  %p3172_p10 = scmp.ne.s32.totalorder %s3159_s23, 0 }
  0x85   : > { %2435 = dma.done.wait (%p3172_p10), [#allocation6], 1232  }
  0x86   : > { %2437 = vsyncadd (%p3172_p10), [#allocation6], 4294966064 }
  0x87   : > { %2439 = dma.done.wait (%p3172_p10), [#allocation9], 16  }
  0x88   : > { %2441 = vsyncadd (%p3172_p10), [#allocation9], 4294967280  ;;  %v2478_v0 = vmov 0   ;;  %v2158_v1 = vld [vmem:[#allocation5] sm:$0xff]   ;;  %v2159_v2 = vld [vmem:[#allocation5 + $0x8] sm:$0xff]   ;;  %vm723_vm0 = vcmask 154624  }
  0x89   : > { %827 = vmatprep.subr.bf16.mxu0 %v2478_v0  ;;  %2037 = vmatprep.subr.bf16.mxu1 %v2478_v0  ;;  %v2160_v3 = vld [vmem:[#allocation5 + $0x10] sm:$0xff]   ;;  %v2161_v4 = vld [vmem:[#allocation5 + $0x18] sm:$0xff]   ;;  %v2170_v5 = vld [vmem:[%s2721_s10 + $0x4] ss:$8 sps:$4 sm:$0xff]   ;;  %vm820_vm1 = vcmask 1040384   ;;  %vm821_vm2 = vcmask 1041408  }
  0x8a   : > { %828 = vmatpush1.bf16.msra.mxu0 %v2158_v1  ;;  %2047 = vmatpush1.bf16.msra.mxu1 %v2158_v1  ;;  %v2173_v6 = vld [vmem:[%s2721_s10 + $0x104] ss:$8 sps:$4 sm:$0xff]   ;;  %v2164_v9 = vld [vmem:[#allocation5 + $0x30] sm:$0xff]   ;;  %v2165_v10 = vld [vmem:[#allocation5 + $0x38] sm:$0xff]   ;;  %v2479_v11 = vmov 65535   ;;  %s1792_s23 = sshll.u32 %s2717_s14, 8 }
  0x8b   : > { %829 = vmatprep.subr.bf16.mxu0 %v2478_v0  ;;  %2038 = vmatprep.subr.bf16.mxu1 %v2478_v0  ;;  %v2162_v7 = vld [vmem:[#allocation5 + $0x20] sm:$0xff]   ;;  %v2163_v8 = vld [vmem:[#allocation5 + $0x28] sm:$0xff]   ;;  %v822_v12 = vsel %vm820_vm1, 4294967295, %v2479_v11  ;;  %v2174_v19 = vld [vmem:[%s2721_s10 + $0x14] ss:$8 sps:$4 sm:$0xff]   ;;  %vm1578_vm3 = vcmask 519168  }
  0x8c   : > { %1867 = vmatprep.mubr.msk.bf16.mxu0 %vm723_vm0, %v2170_v5  ;;  %1883 = vmatprep.mubr.msk.bf16.mxu1 %vm723_vm0, %v2173_v6  ;;  %v2166_v13 = vld [vmem:[#allocation5 + $0x40] sm:$0xff]   ;;  %v2167_v14 = vld [vmem:[#allocation5 + $0x48] ss:$0 sps:$4 sm:$0x33]   ;;  %v823_v15 = vsel %vm821_vm2, %v822_v12, 0  ;;  %s2844_s25 = scalar_lea.vmem [#allocation10], %s1792_s23 }
  0x8d   : > { %v825_v16 = vand.u32 %v2167_v14, %v823_v15  ;;  %v2168_v17 = vld [vmem:[%s2721_s10] ss:$8 sps:$4 sm:$0xff]   ;;  %v2176_v20 = vld [vmem:[%s2721_s10 + $0x114] ss:$8 sps:$4 sm:$0xff]   ;;  %v2178_v21 = vld [vmem:[%s2721_s10 + $0x10] ss:$8 sps:$4 sm:$0xff]  }
  0x8e   : > { %830 = vmatpush1.bf16.msra.mxu0 %v2159_v2  ;;  %2048 = vmatpush1.bf16.msra.mxu1 %v2159_v2  ;;  %v2171_v18 = vld [vmem:[%s2721_s10 + $0x100] ss:$8 sps:$4 sm:$0xff]   ;;  %v2179_v22 = vld [vmem:[%s2721_s10 + $0x110] ss:$8 sps:$4 sm:$0xff]   ;;  %v2180_v23 = vld [vmem:[%s2721_s10 + $0x24] ss:$8 sps:$4 sm:$0xff]  }
  0x8f   : > { %831 = vmatprep.subr.bf16.mxu0 %v2478_v0  ;;  %2039 = vmatprep.subr.bf16.mxu1 %v2478_v0  ;;  %v2182_v24 = vld [vmem:[%s2721_s10 + $0x124] ss:$8 sps:$4 sm:$0xff]   ;;  %v2184_v25 = vld [vmem:[%s2721_s10 + $0x20] ss:$8 sps:$4 sm:$0xff]   ;;  %v2186_v27 = vld [vmem:[%s2721_s10 + $0x34] ss:$8 sps:$4 sm:$0xff]  }
  0x90   : > { %v2185_v26 = vld [vmem:[%s2721_s10 + $0x120] ss:$8 sps:$4 sm:$0xff]   ;;  %v2188_v28 = vld [vmem:[%s2721_s10 + $0x134] ss:$8 sps:$4 sm:$0xff]   ;;  %v2190_v29 = vld [vmem:[%s2721_s10 + $0x30] ss:$8 sps:$4 sm:$0xff]  }
  0x91   : > { %v2191_v30 = vld [vmem:[%s2721_s10 + $0x130] ss:$8 sps:$4 sm:$0xff]   ;;  %v2192_v31 = vld [vmem:[%s2721_s10 + $0x44] ss:$8 sps:$4 sm:$0xff]   ;;  %v2196_v33 = vld [vmem:[%s2721_s10 + $0x40] ss:$8 sps:$4 sm:$0xff]  }
  0x92   : > { %832 = vmatpush1.bf16.msra.mxu0 %v2160_v3  ;;  %2049 = vmatpush1.bf16.msra.mxu1 %v2160_v3  ;;  %v2194_v32 = vld [vmem:[%s2721_s10 + $0x144] ss:$8 sps:$4 sm:$0xff]   ;;  %v2197_v34 = vld [vmem:[%s2721_s10 + $0x140] ss:$8 sps:$4 sm:$0xff]   ;;  %v2198_v35 = vld [vmem:[%s2721_s10 + $0x54] ss:$8 sps:$4 sm:$0xff]  }
  0x93   : > { %833 = vmatprep.subr.bf16.mxu0 %v2478_v0  ;;  %2040 = vmatprep.subr.bf16.mxu1 %v2478_v0  ;;  %v2200_v36 = vld [vmem:[%s2721_s10 + $0x154] ss:$8 sps:$4 sm:$0xff]   ;;  %v2202_v37 = vld [vmem:[%s2721_s10 + $0x50] ss:$8 sps:$4 sm:$0xff]   ;;  %v2204_v39 = vld [vmem:[%s2721_s10 + $0x64] ss:$8 sps:$4 sm:$0xff]  }
  0x94   : > { %v2203_v38 = vld [vmem:[%s2721_s10 + $0x150] ss:$8 sps:$4 sm:$0xff]   ;;  %v2206_v40 = vld [vmem:[%s2721_s10 + $0x164] ss:$8 sps:$4 sm:$0xff]   ;;  %v2208_v41 = vld [vmem:[%s2721_s10 + $0x60] ss:$8 sps:$4 sm:$0xff]  }
  0x95   : > { %v2209_v42 = vld [vmem:[%s2721_s10 + $0x160] ss:$8 sps:$4 sm:$0xff]   ;;  %v2210_v43 = vld [vmem:[%s2721_s10 + $0x74] ss:$8 sps:$4 sm:$0xff]   ;;  %v2214_v45 = vld [vmem:[%s2721_s10 + $0x70] ss:$8 sps:$4 sm:$0xff]  }
  0x96   : > { %834 = vmatpush1.bf16.msra.mxu0 %v2161_v4  ;;  %2050 = vmatpush1.bf16.msra.mxu1 %v2161_v4  ;;  %v2212_v44 = vld [vmem:[%s2721_s10 + $0x174] ss:$8 sps:$4 sm:$0xff]   ;;  %v2215_v46 = vld [vmem:[%s2721_s10 + $0x170] ss:$8 sps:$4 sm:$0xff]   ;;  %v2216_v47 = vld [vmem:[%s2721_s10 + $0x84] ss:$8 sps:$4 sm:$0xff]  }
  0x97   : > { %835 = vmatprep.subr.bf16.mxu0 %v2478_v0  ;;  %2041 = vmatprep.subr.bf16.mxu1 %v2478_v0  ;;  %v2218_v48 = vld [vmem:[%s2721_s10 + $0x184] ss:$8 sps:$4 sm:$0xff]   ;;  %v2220_v49 = vld [vmem:[%s2721_s10 + $0x80] ss:$8 sps:$4 sm:$0xff]   ;;  %v2222_v51 = vld [vmem:[%s2721_s10 + $0x94] ss:$8 sps:$4 sm:$0xff]  }
  0x98   : > { %v2221_v50 = vld [vmem:[%s2721_s10 + $0x180] ss:$8 sps:$4 sm:$0xff]   ;;  %v2224_v52 = vld [vmem:[%s2721_s10 + $0x194] ss:$8 sps:$4 sm:$0xff]   ;;  %v2226_v53 = vld [vmem:[%s2721_s10 + $0x90] ss:$8 sps:$4 sm:$0xff]  }
  0x99   : > { %v2227_v54 = vld [vmem:[%s2721_s10 + $0x190] ss:$8 sps:$4 sm:$0xff]   ;;  %v2228_v55 = vld [vmem:[%s2721_s10 + $0xa4] ss:$8 sps:$4 sm:$0xff]   ;;  %v2232_v57 = vld [vmem:[%s2721_s10 + $0xa0] ss:$8 sps:$4 sm:$0xff]  }
  0x9a   : > { %836 = vmatpush1.bf16.msra.mxu0 %v2162_v7  ;;  %2051 = vmatpush1.bf16.msra.mxu1 %v2162_v7  ;;  %v2230_v56 = vld [vmem:[%s2721_s10 + $0x1a4] ss:$8 sps:$4 sm:$0xff]   ;;  %v2233_v58 = vld [vmem:[%s2721_s10 + $0x1a0] ss:$8 sps:$4 sm:$0xff]   ;;  %v2234_v59 = vld [vmem:[%s2721_s10 + $0xb4] ss:$8 sps:$4 sm:$0xff]  }
  0x9b   : > { %837 = vmatprep.subr.bf16.mxu0 %v2478_v0  ;;  %2042 = vmatprep.subr.bf16.mxu1 %v2478_v0  ;;  %v2236_v60 = vld [vmem:[%s2721_s10 + $0x1b4] ss:$8 sps:$4 sm:$0xff]   ;;  %v2238_v61 = vld [vmem:[%s2721_s10 + $0xb0] ss:$8 sps:$4 sm:$0xff]   ;;  %v2240_v63 = vld [vmem:[%s2721_s10 + $0xc4] ss:$8 sps:$4 sm:$0xff]  }
  0x9c   : > { %v2239_v62 = vld [vmem:[%s2721_s10 + $0x1b0] ss:$8 sps:$4 sm:$0xff]   ;;  %v2244_v1 = vld [vmem:[%s2721_s10 + $0xc0] ss:$8 sps:$4 sm:$0xff]   ;;  %v2246_v3 = vld [vmem:[%s2721_s10 + $0xd4] ss:$8 sps:$4 sm:$0xff]  }
  0x9d   : > { %v2245_v2 = vld [vmem:[%s2721_s10 + $0x1c0] ss:$8 sps:$4 sm:$0xff]   ;;  %v2248_v4 = vld [vmem:[%s2721_s10 + $0x1d4] ss:$8 sps:$4 sm:$0xff]   ;;  %v2250_v5 = vld [vmem:[%s2721_s10 + $0xd0] ss:$8 sps:$4 sm:$0xff]  }
  0x9e   : > { %838 = vmatpush1.bf16.msra.mxu0 %v2163_v8  ;;  %2052 = vmatpush1.bf16.msra.mxu1 %v2163_v8  ;;  %v2251_v6 = vld [vmem:[%s2721_s10 + $0x1d0] ss:$8 sps:$4 sm:$0xff]   ;;  %v2252_v7 = vld [vmem:[%s2721_s10 + $0xe4] ss:$8 sps:$4 sm:$0xff]   ;;  %v2258_v11 = vld [vmem:[%s2721_s10 + $0xf4] ss:$8 sps:$4 sm:$0xff]  }
  0x9f   : > { %839 = vmatprep.subr.bf16.mxu0 %v2478_v0  ;;  %2043 = vmatprep.subr.bf16.mxu1 %v2478_v0  ;;  %v2254_v8 = vld [vmem:[%s2721_s10 + $0x1e4] ss:$8 sps:$4 sm:$0xff]   ;;  %v2260_v12 = vld [vmem:[%s2721_s10 + $0x1f4] ss:$8 sps:$4 sm:$0xff]   ;;  %v2263_v14 = vld [vmem:[%s2721_s10 + $0x1f0] ss:$8 sps:$4 sm:$0xff]  }
  0xa0   : > { %v2831_v15 = vld [vmem:[#allocation7] ss:$0 sm:$0xff]  ;;  %s2036_s27 = sshll.u32 %s2460_s18, 12  ;;  %s1658_s24 = sshll.u32 %s2844_s25, 4  ;;  %s3093_s24 = int_to_ptr.vmem [resolvable:$true] %s1658_s24 }
  0xa1   : > { %s3091_s6 = scalar_lea.hbm %s3153_s4, %s2036_s27  ;;  %s1644_s18 = scalar_lea.sflag [#allocation4], %s2717_s14 }
  0xa2   : > { %840 = vmatpush1.bf16.msra.mxu0 %v2164_v9  ;;  %2053 = vmatpush1.bf16.msra.mxu1 %v2164_v9  ;;  %v2256_v9 = vld [vmem:[%s2721_s10 + $0xe0] ss:$8 sps:$4 sm:$0xff]   ;;  %s2378_s7 = scalar_lea.vmem %s3093_s24, 4096  ;;  %s2480_s12 = smov [#allocation10]  }
  0xa3   : > { %841 = vmatprep.subr.bf16.mxu0 %v2478_v0  ;;  %2044 = vmatprep.subr.bf16.mxu1 %v2478_v0  ;;  %p2379_p12 = scmp.ne.s32.totalorder %s3093_s24, %s2378_s7  ;;  %s2382_s13 = sshll.u32 %s2480_s12, 4  ;;  %s2383_s13 = int_to_ptr.vmem [resolvable:$false] %s2382_s13 }
  0xa4   : > { %s2384_s21 = scalar_lea.vmem %s2383_s13, 8192  ;;  %p2385_p5 = scmp.lt.s32.totalorder %s3093_s24, %s2383_s13 }
  0xa5   : > { %p2380_p6 = pnand %p2379_p12, %p2659_p0  ;;  %p2386_p7 = scmp.lt.s32.totalorder %s2384_s21, %s2378_s7 }
  0xa6   : > { %842 = vmatpush1.bf16.msra.mxu0 %v2165_v10  ;;  %2054 = vmatpush1.bf16.msra.mxu1 %v2165_v10  ;;  %v2257_v10 = vld [vmem:[%s2721_s10 + $0x1e0] ss:$8 sps:$4 sm:$0xff]  }
  0xa7   : > { %843 = vmatprep.subr.bf16.mxu0 %v2478_v0  ;;  %2045 = vmatprep.subr.bf16.mxu1 %v2478_v0  ;;  %p2381_p3 = pneg %p2380_p6  ;;  %p2387_p9 = por %p2386_p7, %p2385_p5 }
  0xa9   : > { %p2388_p13 = pnand %p2387_p9, %p2381_p3 }
  0xaa   : > { %844 = vmatpush1.bf16.msra.mxu0 %v2166_v13  ;;  %2055 = vmatpush1.bf16.msra.mxu1 %v2166_v13  ;;  %v2262_v13 = vld [vmem:[%s2721_s10 + $0xf0] ss:$8 sps:$4 sm:$0xff]  }
  0xab   : > { %845 = vmatprep.subr.bf16.mxu0 %v2478_v0  ;;  %2046 = vmatprep.subr.bf16.mxu1 %v2478_v0  ;;  %v2242_v0 = vld [vmem:[%s2721_s10 + $0x1c4] ss:$8 sps:$4 sm:$0xff]  }
  0xae   : > { %846 = vmatpush1.bf16.msra.mxu0 %v825_v16  ;;  %2056 = vmatpush1.bf16.msra.mxu1 %v825_v16 }
  0xb1   : > { %860 = vmatmul.mubr.bf16.vlgmr.msra.gmra.mrb[0].mxu0 %v2168_v17  ;;  %988 = vmatmul.mubr.bf16.vlgmr.msra.gmra.mrb[0].mxu1 %v2171_v18  ;;  %v2833_v17 = vld [vmem:[#allocation8] ss:$0 sm:$0xff] }
  0xb2   : > { %1868 = vmatprep.mubr.msk.bf16.mxu0 %vm723_vm0, %v2174_v19  ;;  %1884 = vmatprep.mubr.msk.bf16.mxu1 %vm723_vm0, %v2176_v20 }
  0xb9   : > { %868 = vmatmul.mubr.bf16.gmra.mrb[4].mxu0 %v2178_v21  ;;  %996 = vmatmul.mubr.bf16.gmra.mrb[4].mxu1 %v2179_v22 }
  0xba   : > { %1869 = vmatprep.mubr.msk.bf16.mxu0 %vm723_vm0, %v2180_v23  ;;  %1885 = vmatprep.mubr.msk.bf16.mxu1 %vm723_vm0, %v2182_v24 }
  0xc1   : > { %876 = vmatmul.mubr.bf16.gmra.mrb[8].mxu0 %v2184_v25  ;;  %1004 = vmatmul.mubr.bf16.gmra.mrb[8].mxu1 %v2185_v26 }
  0xc2   : > { %1870 = vmatprep.mubr.msk.bf16.mxu0 %vm723_vm0, %v2186_v27  ;;  %1886 = vmatprep.mubr.msk.bf16.mxu1 %vm723_vm0, %v2188_v28 }
  0xc9   : > { %884 = vmatmul.mubr.bf16.gmra.mrb[12].mxu0 %v2190_v29  ;;  %1012 = vmatmul.mubr.bf16.gmra.mrb[12].mxu1 %v2191_v30 }
  0xca   : > { %1871 = vmatprep.mubr.msk.bf16.mxu0 %vm723_vm0, %v2192_v31  ;;  %1887 = vmatprep.mubr.msk.bf16.mxu1 %vm723_vm0, %v2194_v32 }
  0xd1   : > { %892 = vmatmul.mubr.bf16.gmra.mrb[16].mxu0 %v2196_v33  ;;  %1020 = vmatmul.mubr.bf16.gmra.mrb[16].mxu1 %v2197_v34 }
  0xd2   : > { %1872 = vmatprep.mubr.msk.bf16.mxu0 %vm723_vm0, %v2198_v35  ;;  %1888 = vmatprep.mubr.msk.bf16.mxu1 %vm723_vm0, %v2200_v36 }
  0xd9   : > { %900 = vmatmul.mubr.bf16.gmra.mrb[20].mxu0 %v2202_v37  ;;  %1028 = vmatmul.mubr.bf16.gmra.mrb[20].mxu1 %v2203_v38 }
  0xda   : > { %1873 = vmatprep.mubr.msk.bf16.mxu0 %vm723_vm0, %v2204_v39  ;;  %1889 = vmatprep.mubr.msk.bf16.mxu1 %vm723_vm0, %v2206_v40 }
  0xe1   : > { %908 = vmatmul.mubr.bf16.gmra.mrb[24].mxu0 %v2208_v41  ;;  %1036 = vmatmul.mubr.bf16.gmra.mrb[24].mxu1 %v2209_v42 }
  0xe2   : > { %1874 = vmatprep.mubr.msk.bf16.mxu0 %vm723_vm0, %v2210_v43  ;;  %1890 = vmatprep.mubr.msk.bf16.mxu1 %vm723_vm0, %v2212_v44 }
  0xe9   : > { %916 = vmatmul.mubr.bf16.gmra.mrb[28].mxu0 %v2214_v45  ;;  %1044 = vmatmul.mubr.bf16.gmra.mrb[28].mxu1 %v2215_v46 }
  0xea   : > { %1875 = vmatprep.mubr.msk.bf16.mxu0 %vm723_vm0, %v2216_v47  ;;  %1891 = vmatprep.mubr.msk.bf16.mxu1 %vm723_vm0, %v2218_v48 }
  0xf1   : > { %924 = vmatmul.mubr.bf16.gmra.mrb[32].mxu0 %v2220_v49  ;;  %1052 = vmatmul.mubr.bf16.gmra.mrb[32].mxu1 %v2221_v50 }
  0xf2   : > { %1876 = vmatprep.mubr.msk.bf16.mxu0 %vm723_vm0, %v2222_v51  ;;  %1892 = vmatprep.mubr.msk.bf16.mxu1 %vm723_vm0, %v2224_v52 }
  0xf9   : > { %932 = vmatmul.mubr.bf16.gmra.mrb[36].mxu0 %v2226_v53  ;;  %1060 = vmatmul.mubr.bf16.gmra.mrb[36].mxu1 %v2227_v54 }
  0xfa   : > { %1877 = vmatprep.mubr.msk.bf16.mxu0 %vm723_vm0, %v2228_v55  ;;  %1893 = vmatprep.mubr.msk.bf16.mxu1 %vm723_vm0, %v2230_v56 }
 0x101   : > { %940 = vmatmul.mubr.bf16.gmra.mrb[40].mxu0 %v2232_v57  ;;  %1068 = vmatmul.mubr.bf16.gmra.mrb[40].mxu1 %v2233_v58 }
 0x102   : > { %1878 = vmatprep.mubr.msk.bf16.mxu0 %vm723_vm0, %v2234_v59  ;;  %1894 = vmatprep.mubr.msk.bf16.mxu1 %vm723_vm0, %v2236_v60 }
 0x109   : > { %948 = vmatmul.mubr.bf16.gmra.mrb[44].mxu0 %v2238_v61  ;;  %1076 = vmatmul.mubr.bf16.gmra.mrb[44].mxu1 %v2239_v62 }
 0x10a   : > { %1879 = vmatprep.mubr.msk.bf16.mxu0 %vm723_vm0, %v2240_v63  ;;  %1895 = vmatprep.mubr.msk.bf16.mxu1 %vm723_vm0, %v2242_v0 }
 0x111   : > { %956 = vmatmul.mubr.bf16.gmra.mrb[48].mxu0 %v2244_v1  ;;  %1084 = vmatmul.mubr.bf16.gmra.mrb[48].mxu1 %v2245_v2 }
 0x112   : > { %1880 = vmatprep.mubr.msk.bf16.mxu0 %vm723_vm0, %v2246_v3  ;;  %1896 = vmatprep.mubr.msk.bf16.mxu1 %vm723_vm0, %v2248_v4 }
 0x119   : > { %964 = vmatmul.mubr.bf16.gmra.mrb[52].mxu0 %v2250_v5  ;;  %1092 = vmatmul.mubr.bf16.gmra.mrb[52].mxu1 %v2251_v6 }
 0x11a   : > { %1881 = vmatprep.mubr.msk.bf16.mxu0 %vm723_vm0, %v2252_v7  ;;  %1897 = vmatprep.mubr.msk.bf16.mxu1 %vm723_vm0, %v2254_v8 }
 0x121   : > { %972 = vmatmul.mubr.bf16.gmra.mrb[56].mxu0 %v2256_v9  ;;  %1100 = vmatmul.mubr.bf16.gmra.mrb[56].mxu1 %v2257_v10 }
 0x122   : > { %1882 = vmatprep.mubr.msk.bf16.mxu0 %vm723_vm0, %v2258_v11  ;;  %1898 = vmatprep.mubr.msk.bf16.mxu1 %vm723_vm0, %v2260_v12 }
 0x129   : > { %980 = vmatmul.mubr.bf16.gmra.mrb[60].mxu0 %v2262_v13  ;;  %1108 = vmatmul.mubr.bf16.gmra.mrb[60].mxu1 %v2263_v14 }
 0x184   : > { %v861_v16 = vpop.f32.mrb[0].mxu0  ;;  %v989_v18 = vpop.f32.mrb[0].mxu1 }
 0x185   : > { %v1123_v19 = vmul.f32 %v2831_v15, %v861_v16  ;;  %v1155_v20 = vmul.f32 %v2831_v15, %v989_v18  ;;  %v863_v21 = vpop.f32.mrb[1].mxu0  ;;  %v991_v22 = vpop.f32.mrb[1].mxu1 }
 0x186   : > { %v864_v23 = vpop.f32.mrb[2].mxu0  ;;  %v992_v24 = vpop.f32.mrb[2].mxu1 }
 0x187   : > { %v1194_v25 = vadd.f32 %v2833_v17, %v1123_v19  ;;  %v1226_v26 = vadd.f32 %v2833_v17, %v1155_v20  ;;  %v1124_v27 = vmul.f32 %v2831_v15, %v864_v23  ;;  %v1156_v28 = vmul.f32 %v2831_v15, %v992_v24  ;;  %v866_v29 = vpop.f32.mrb[3].mxu0  ;;  %v994_v30 = vpop.f32.mrb[3].mxu1 }
 0x189   : > { %v1258_v31 = vmax.f32 %v1194_v25, 0.0  ;;  %v1290_v32 = vmax.f32 %v1226_v26, 0.0  ;;  %v1195_v33 = vadd.f32 %v2833_v17, %v1124_v27  ;;  %v1227_v34 = vadd.f32 %v2833_v17, %v1156_v28 }
 0x18b   : > { %v1972_v35 = vpack.c.bf16 %v1258_v31, %v1258_v31  ;;  %v2004_v36 = vpack.c.bf16 %v1290_v32, %v1290_v32  ;;  %v1259_v37 = vmax.f32 %v1195_v33, 0.0  ;;  %v1291_v38 = vmax.f32 %v1227_v34, 0.0 }
 0x18c   : > { %v869_v39 = vpop.f32.mrb[4].mxu0  ;;  %v997_v40 = vpop.f32.mrb[4].mxu1 }
 0x18d   : > { %1579 = vst.msk [vmem:[%s2844_s25] sm:$0xf] %vm1578_vm3, %v1972_v35  ;;  %1611 = vst.msk [vmem:[%s2844_s25 + $0x80] sm:$0xf] %vm1578_vm3, %v2004_v36  ;;  %v1973_v41 = vpack.c.bf16 %v1259_v37, %v1259_v37  ;;  %v2005_v42 = vpack.c.bf16 %v1291_v38, %v1291_v38  ;;  %v1125_v43 = vmul.f32 %v2831_v15, %v869_v39  ;;  %v871_v45 = vpop.f32.mrb[5].mxu0  ;;  %v999_v46 = vpop.f32.mrb[5].mxu1 }
 0x18e   : > { %v1157_v44 = vmul.f32 %v2831_v15, %v997_v40  ;;  %v872_v47 = vpop.f32.mrb[6].mxu0  ;;  %v1000_v48 = vpop.f32.mrb[6].mxu1 }
 0x18f   : > { %1580 = vst.msk [vmem:[%s2844_s25 + $0x4] sm:$0xf] %vm1578_vm3, %v1973_v41  ;;  %1612 = vst.msk [vmem:[%s2844_s25 + $0x84] sm:$0xf] %vm1578_vm3, %v2005_v42  ;;  %v1196_v49 = vadd.f32 %v2833_v17, %v1125_v43  ;;  %v1126_v51 = vmul.f32 %v2831_v15, %v872_v47  ;;  %v1158_v52 = vmul.f32 %v2831_v15, %v1000_v48  ;;  %v874_v53 = vpop.f32.mrb[7].mxu0  ;;  %v1002_v54 = vpop.f32.mrb[7].mxu1 }
 0x190   : > { %v1228_v50 = vadd.f32 %v2833_v17, %v1157_v44 }
 0x191   : > { %v1260_v55 = vmax.f32 %v1196_v49, 0.0  ;;  %v1197_v57 = vadd.f32 %v2833_v17, %v1126_v51  ;;  %v1229_v58 = vadd.f32 %v2833_v17, %v1158_v52 }
 0x192   : > { %v1292_v56 = vmax.f32 %v1228_v50, 0.0 }
 0x193   : > { %v1974_v59 = vpack.c.bf16 %v1260_v55, %v1260_v55  ;;  %v1261_v61 = vmax.f32 %v1197_v57, 0.0  ;;  %v1293_v62 = vmax.f32 %v1229_v58, 0.0 }
 0x194   : > { %v2006_v60 = vpack.c.bf16 %v1292_v56, %v1292_v56  ;;  %v877_v63 = vpop.f32.mrb[8].mxu0  ;;  %v1005_v0 = vpop.f32.mrb[8].mxu1 }
 0x195   : > { %1581 = vst.msk [vmem:[%s2844_s25 + $0x8] sm:$0xf] %vm1578_vm3, %v1974_v59  ;;  %v1975_v1 = vpack.c.bf16 %v1261_v61, %v1261_v61  ;;  %v2007_v2 = vpack.c.bf16 %v1293_v62, %v1293_v62  ;;  %v1127_v3 = vmul.f32 %v2831_v15, %v877_v63  ;;  %v1159_v4 = vmul.f32 %v2831_v15, %v1005_v0  ;;  %v879_v5 = vpop.f32.mrb[9].mxu0  ;;  %v1007_v6 = vpop.f32.mrb[9].mxu1 }
 0x196   : > { %1613 = vst.msk [vmem:[%s2844_s25 + $0x88] sm:$0xf] %vm1578_vm3, %v2006_v60  ;;  %v880_v7 = vpop.f32.mrb[10].mxu0  ;;  %v1008_v8 = vpop.f32.mrb[10].mxu1 }
 0x197   : > { %1582 = vst.msk [vmem:[%s2844_s25 + $0xc] sm:$0xf] %vm1578_vm3, %v1975_v1  ;;  %1614 = vst.msk [vmem:[%s2844_s25 + $0x8c] sm:$0xf] %vm1578_vm3, %v2007_v2  ;;  %v1198_v9 = vadd.f32 %v2833_v17, %v1127_v3  ;;  %v1230_v10 = vadd.f32 %v2833_v17, %v1159_v4  ;;  %v1128_v11 = vmul.f32 %v2831_v15, %v880_v7  ;;  %v882_v13 = vpop.f32.mrb[11].mxu0  ;;  %v1010_v14 = vpop.f32.mrb[11].mxu1 }
 0x198   : > { %v1160_v12 = vmul.f32 %v2831_v15, %v1008_v8 }
 0x199   : > { %v1262_v16 = vmax.f32 %v1198_v9, 0.0  ;;  %v1294_v18 = vmax.f32 %v1230_v10, 0.0  ;;  %v1199_v19 = vadd.f32 %v2833_v17, %v1128_v11 }
 0x19a   : > { %v1231_v20 = vadd.f32 %v2833_v17, %v1160_v12 }
 0x19b   : > { %v1976_v21 = vpack.c.bf16 %v1262_v16, %v1262_v16  ;;  %v2008_v22 = vpack.c.bf16 %v1294_v18, %v1294_v18  ;;  %v1263_v23 = vmax.f32 %v1199_v19, 0.0 }
 0x19c   : > { %v1295_v24 = vmax.f32 %v1231_v20, 0.0  ;;  %v885_v25 = vpop.f32.mrb[12].mxu0  ;;  %v1013_v26 = vpop.f32.mrb[12].mxu1 }
 0x19d   : > { %1583 = vst.msk [vmem:[%s2844_s25 + $0x10] sm:$0xf] %vm1578_vm3, %v1976_v21  ;;  %1615 = vst.msk [vmem:[%s2844_s25 + $0x90] sm:$0xf] %vm1578_vm3, %v2008_v22  ;;  %v1977_v27 = vpack.c.bf16 %v1263_v23, %v1263_v23  ;;  %v1129_v29 = vmul.f32 %v2831_v15, %v885_v25  ;;  %v1161_v30 = vmul.f32 %v2831_v15, %v1013_v26  ;;  %v887_v31 = vpop.f32.mrb[13].mxu0  ;;  %v1015_v32 = vpop.f32.mrb[13].mxu1 }
 0x19e   : > { %v2009_v28 = vpack.c.bf16 %v1295_v24, %v1295_v24  ;;  %v888_v33 = vpop.f32.mrb[14].mxu0  ;;  %v1016_v34 = vpop.f32.mrb[14].mxu1 }
 0x19f   : > { %1584 = vst.msk [vmem:[%s2844_s25 + $0x14] sm:$0xf] %vm1578_vm3, %v1977_v27  ;;  %v1200_v35 = vadd.f32 %v2833_v17, %v1129_v29  ;;  %v1232_v36 = vadd.f32 %v2833_v17, %v1161_v30  ;;  %v1130_v37 = vmul.f32 %v2831_v15, %v888_v33  ;;  %v1162_v38 = vmul.f32 %v2831_v15, %v1016_v34  ;;  %v890_v39 = vpop.f32.mrb[15].mxu0  ;;  %v1018_v40 = vpop.f32.mrb[15].mxu1 }
 0x1a0   : > { %1616 = vst.msk [vmem:[%s2844_s25 + $0x94] sm:$0xf] %vm1578_vm3, %v2009_v28 }
 0x1a1   : > { %v1264_v41 = vmax.f32 %v1200_v35, 0.0  ;;  %v1296_v42 = vmax.f32 %v1232_v36, 0.0  ;;  %v1201_v43 = vadd.f32 %v2833_v17, %v1130_v37  ;;  %v1233_v44 = vadd.f32 %v2833_v17, %v1162_v38 }
 0x1a3   : > { %v1978_v45 = vpack.c.bf16 %v1264_v41, %v1264_v41  ;;  %v2010_v46 = vpack.c.bf16 %v1296_v42, %v1296_v42  ;;  %v1265_v47 = vmax.f32 %v1201_v43, 0.0  ;;  %v1297_v48 = vmax.f32 %v1233_v44, 0.0 }
 0x1a4   : > { %v893_v49 = vpop.f32.mrb[16].mxu0  ;;  %v1021_v50 = vpop.f32.mrb[16].mxu1 }
 0x1a5   : > { %1585 = vst.msk [vmem:[%s2844_s25 + $0x18] sm:$0xf] %vm1578_vm3, %v1978_v45  ;;  %1617 = vst.msk [vmem:[%s2844_s25 + $0x98] sm:$0xf] %vm1578_vm3, %v2010_v46  ;;  %v1979_v51 = vpack.c.bf16 %v1265_v47, %v1265_v47  ;;  %v2011_v52 = vpack.c.bf16 %v1297_v48, %v1297_v48  ;;  %v1131_v53 = vmul.f32 %v2831_v15, %v893_v49  ;;  %v895_v55 = vpop.f32.mrb[17].mxu0  ;;  %v1023_v56 = vpop.f32.mrb[17].mxu1 }
 0x1a6   : > { %v1163_v54 = vmul.f32 %v2831_v15, %v1021_v50  ;;  %v896_v57 = vpop.f32.mrb[18].mxu0  ;;  %v1024_v58 = vpop.f32.mrb[18].mxu1 }
 0x1a7   : > { %1586 = vst.msk [vmem:[%s2844_s25 + $0x1c] sm:$0xf] %vm1578_vm3, %v1979_v51  ;;  %1618 = vst.msk [vmem:[%s2844_s25 + $0x9c] sm:$0xf] %vm1578_vm3, %v2011_v52  ;;  %v1202_v59 = vadd.f32 %v2833_v17, %v1131_v53  ;;  %v1132_v61 = vmul.f32 %v2831_v15, %v896_v57  ;;  %v1164_v62 = vmul.f32 %v2831_v15, %v1024_v58  ;;  %v898_v63 = vpop.f32.mrb[19].mxu0  ;;  %v1026_v0 = vpop.f32.mrb[19].mxu1 }
 0x1a8   : > { %v1234_v60 = vadd.f32 %v2833_v17, %v1163_v54 }
 0x1a9   : > { %v1266_v1 = vmax.f32 %v1202_v59, 0.0  ;;  %v1203_v3 = vadd.f32 %v2833_v17, %v1132_v61  ;;  %v1235_v4 = vadd.f32 %v2833_v17, %v1164_v62 }
 0x1aa   : > { %v1298_v2 = vmax.f32 %v1234_v60, 0.0 }
 0x1ab   : > { %v1980_v5 = vpack.c.bf16 %v1266_v1, %v1266_v1  ;;  %v1267_v7 = vmax.f32 %v1203_v3, 0.0  ;;  %v1299_v8 = vmax.f32 %v1235_v4, 0.0 }
 0x1ac   : > { %v2012_v6 = vpack.c.bf16 %v1298_v2, %v1298_v2  ;;  %v901_v9 = vpop.f32.mrb[20].mxu0  ;;  %v1029_v10 = vpop.f32.mrb[20].mxu1 }
 0x1ad   : > { %1587 = vst.msk [vmem:[%s2844_s25 + $0x20] sm:$0xf] %vm1578_vm3, %v1980_v5  ;;  %v1981_v11 = vpack.c.bf16 %v1267_v7, %v1267_v7  ;;  %v2013_v12 = vpack.c.bf16 %v1299_v8, %v1299_v8  ;;  %v1133_v13 = vmul.f32 %v2831_v15, %v901_v9  ;;  %v1165_v14 = vmul.f32 %v2831_v15, %v1029_v10  ;;  %v903_v16 = vpop.f32.mrb[21].mxu0  ;;  %v1031_v18 = vpop.f32.mrb[21].mxu1 }
 0x1ae   : > { %1619 = vst.msk [vmem:[%s2844_s25 + $0xa0] sm:$0xf] %vm1578_vm3, %v2012_v6  ;;  %v904_v19 = vpop.f32.mrb[22].mxu0  ;;  %v1032_v20 = vpop.f32.mrb[22].mxu1 }
 0x1af   : > { %1588 = vst.msk [vmem:[%s2844_s25 + $0x24] sm:$0xf] %vm1578_vm3, %v1981_v11  ;;  %1620 = vst.msk [vmem:[%s2844_s25 + $0xa4] sm:$0xf] %vm1578_vm3, %v2013_v12  ;;  %v1204_v21 = vadd.f32 %v2833_v17, %v1133_v13  ;;  %v1236_v22 = vadd.f32 %v2833_v17, %v1165_v14  ;;  %v1134_v23 = vmul.f32 %v2831_v15, %v904_v19  ;;  %v906_v25 = vpop.f32.mrb[23].mxu0  ;;  %v1034_v26 = vpop.f32.mrb[23].mxu1 }
 0x1b0   : > { %v1166_v24 = vmul.f32 %v2831_v15, %v1032_v20 }
 0x1b1   : > { %v1268_v27 = vmax.f32 %v1204_v21, 0.0  ;;  %v1300_v28 = vmax.f32 %v1236_v22, 0.0  ;;  %v1205_v29 = vadd.f32 %v2833_v17, %v1134_v23 }
 0x1b2   : > { %v1237_v30 = vadd.f32 %v2833_v17, %v1166_v24 }
 0x1b3   : > { %v1982_v31 = vpack.c.bf16 %v1268_v27, %v1268_v27  ;;  %v2014_v32 = vpack.c.bf16 %v1300_v28, %v1300_v28  ;;  %v1269_v33 = vmax.f32 %v1205_v29, 0.0 }
 0x1b4   : > { %v1301_v34 = vmax.f32 %v1237_v30, 0.0  ;;  %v909_v35 = vpop.f32.mrb[24].mxu0  ;;  %v1037_v36 = vpop.f32.mrb[24].mxu1 }
 0x1b5   : > { %1589 = vst.msk [vmem:[%s2844_s25 + $0x28] sm:$0xf] %vm1578_vm3, %v1982_v31  ;;  %1621 = vst.msk [vmem:[%s2844_s25 + $0xa8] sm:$0xf] %vm1578_vm3, %v2014_v32  ;;  %v1983_v37 = vpack.c.bf16 %v1269_v33, %v1269_v33  ;;  %v1135_v39 = vmul.f32 %v2831_v15, %v909_v35  ;;  %v1167_v40 = vmul.f32 %v2831_v15, %v1037_v36  ;;  %v911_v41 = vpop.f32.mrb[25].mxu0  ;;  %v1039_v42 = vpop.f32.mrb[25].mxu1 }
 0x1b6   : > { %v2015_v38 = vpack.c.bf16 %v1301_v34, %v1301_v34  ;;  %v912_v43 = vpop.f32.mrb[26].mxu0  ;;  %v1040_v44 = vpop.f32.mrb[26].mxu1 }
 0x1b7   : > { %1590 = vst.msk [vmem:[%s2844_s25 + $0x2c] sm:$0xf] %vm1578_vm3, %v1983_v37  ;;  %v1206_v45 = vadd.f32 %v2833_v17, %v1135_v39  ;;  %v1238_v46 = vadd.f32 %v2833_v17, %v1167_v40  ;;  %v1136_v47 = vmul.f32 %v2831_v15, %v912_v43  ;;  %v1168_v48 = vmul.f32 %v2831_v15, %v1040_v44  ;;  %v914_v49 = vpop.f32.mrb[27].mxu0  ;;  %v1042_v50 = vpop.f32.mrb[27].mxu1 }
 0x1b8   : > { %1622 = vst.msk [vmem:[%s2844_s25 + $0xac] sm:$0xf] %vm1578_vm3, %v2015_v38 }
 0x1b9   : > { %v1270_v51 = vmax.f32 %v1206_v45, 0.0  ;;  %v1302_v52 = vmax.f32 %v1238_v46, 0.0  ;;  %v1207_v53 = vadd.f32 %v2833_v17, %v1136_v47  ;;  %v1239_v54 = vadd.f32 %v2833_v17, %v1168_v48 }
 0x1bb   : > { %v1984_v55 = vpack.c.bf16 %v1270_v51, %v1270_v51  ;;  %v2016_v56 = vpack.c.bf16 %v1302_v52, %v1302_v52  ;;  %v1271_v57 = vmax.f32 %v1207_v53, 0.0  ;;  %v1303_v58 = vmax.f32 %v1239_v54, 0.0 }
 0x1bc   : > { %v917_v59 = vpop.f32.mrb[28].mxu0  ;;  %v1045_v60 = vpop.f32.mrb[28].mxu1 }
 0x1bd   : > { %1591 = vst.msk [vmem:[%s2844_s25 + $0x30] sm:$0xf] %vm1578_vm3, %v1984_v55  ;;  %1623 = vst.msk [vmem:[%s2844_s25 + $0xb0] sm:$0xf] %vm1578_vm3, %v2016_v56  ;;  %v1985_v61 = vpack.c.bf16 %v1271_v57, %v1271_v57  ;;  %v2017_v62 = vpack.c.bf16 %v1303_v58, %v1303_v58  ;;  %v1137_v63 = vmul.f32 %v2831_v15, %v917_v59  ;;  %v919_v1 = vpop.f32.mrb[29].mxu0  ;;  %v1047_v2 = vpop.f32.mrb[29].mxu1 }
 0x1be   : > { %v1169_v0 = vmul.f32 %v2831_v15, %v1045_v60  ;;  %v920_v3 = vpop.f32.mrb[30].mxu0  ;;  %v1048_v4 = vpop.f32.mrb[30].mxu1 }
 0x1bf   : > { %1592 = vst.msk [vmem:[%s2844_s25 + $0x34] sm:$0xf] %vm1578_vm3, %v1985_v61  ;;  %1624 = vst.msk [vmem:[%s2844_s25 + $0xb4] sm:$0xf] %vm1578_vm3, %v2017_v62  ;;  %v1208_v5 = vadd.f32 %v2833_v17, %v1137_v63  ;;  %v1138_v7 = vmul.f32 %v2831_v15, %v920_v3  ;;  %v1170_v8 = vmul.f32 %v2831_v15, %v1048_v4  ;;  %v922_v9 = vpop.f32.mrb[31].mxu0  ;;  %v1050_v10 = vpop.f32.mrb[31].mxu1 }
 0x1c0   : > { %v1240_v6 = vadd.f32 %v2833_v17, %v1169_v0 }
 0x1c1   : > { %v1272_v11 = vmax.f32 %v1208_v5, 0.0  ;;  %v1209_v13 = vadd.f32 %v2833_v17, %v1138_v7  ;;  %v1241_v14 = vadd.f32 %v2833_v17, %v1170_v8 }
 0x1c2   : > { %v1304_v12 = vmax.f32 %v1240_v6, 0.0 }
 0x1c3   : > { %v1986_v16 = vpack.c.bf16 %v1272_v11, %v1272_v11  ;;  %v1273_v19 = vmax.f32 %v1209_v13, 0.0  ;;  %v1305_v20 = vmax.f32 %v1241_v14, 0.0 }
 0x1c4   : > { %v2018_v18 = vpack.c.bf16 %v1304_v12, %v1304_v12  ;;  %v925_v21 = vpop.f32.mrb[32].mxu0  ;;  %v1053_v22 = vpop.f32.mrb[32].mxu1 }
 0x1c5   : > { %1593 = vst.msk [vmem:[%s2844_s25 + $0x38] sm:$0xf] %vm1578_vm3, %v1986_v16  ;;  %v1987_v23 = vpack.c.bf16 %v1273_v19, %v1273_v19  ;;  %v2019_v24 = vpack.c.bf16 %v1305_v20, %v1305_v20  ;;  %v1139_v25 = vmul.f32 %v2831_v15, %v925_v21  ;;  %v1171_v26 = vmul.f32 %v2831_v15, %v1053_v22  ;;  %v927_v27 = vpop.f32.mrb[33].mxu0  ;;  %v1055_v28 = vpop.f32.mrb[33].mxu1 }
 0x1c6   : > { %1625 = vst.msk [vmem:[%s2844_s25 + $0xb8] sm:$0xf] %vm1578_vm3, %v2018_v18  ;;  %v928_v29 = vpop.f32.mrb[34].mxu0  ;;  %v1056_v30 = vpop.f32.mrb[34].mxu1 }
 0x1c7   : > { %1594 = vst.msk [vmem:[%s2844_s25 + $0x3c] sm:$0xf] %vm1578_vm3, %v1987_v23  ;;  %1626 = vst.msk [vmem:[%s2844_s25 + $0xbc] sm:$0xf] %vm1578_vm3, %v2019_v24  ;;  %v1210_v31 = vadd.f32 %v2833_v17, %v1139_v25  ;;  %v1242_v32 = vadd.f32 %v2833_v17, %v1171_v26  ;;  %v1140_v33 = vmul.f32 %v2831_v15, %v928_v29  ;;  %v930_v35 = vpop.f32.mrb[35].mxu0  ;;  %v1058_v36 = vpop.f32.mrb[35].mxu1 }
 0x1c8   : > { %v1172_v34 = vmul.f32 %v2831_v15, %v1056_v30 }
 0x1c9   : > { %v1274_v37 = vmax.f32 %v1210_v31, 0.0  ;;  %v1306_v38 = vmax.f32 %v1242_v32, 0.0  ;;  %v1211_v39 = vadd.f32 %v2833_v17, %v1140_v33 }
 0x1ca   : > { %v1243_v40 = vadd.f32 %v2833_v17, %v1172_v34 }
 0x1cb   : > { %v1988_v41 = vpack.c.bf16 %v1274_v37, %v1274_v37  ;;  %v2020_v42 = vpack.c.bf16 %v1306_v38, %v1306_v38  ;;  %v1275_v43 = vmax.f32 %v1211_v39, 0.0 }
 0x1cc   : > { %v1307_v44 = vmax.f32 %v1243_v40, 0.0  ;;  %v933_v45 = vpop.f32.mrb[36].mxu0  ;;  %v1061_v46 = vpop.f32.mrb[36].mxu1 }
 0x1cd   : > { %1595 = vst.msk [vmem:[%s2844_s25 + $0x40] sm:$0xf] %vm1578_vm3, %v1988_v41  ;;  %1627 = vst.msk [vmem:[%s2844_s25 + $0xc0] sm:$0xf] %vm1578_vm3, %v2020_v42  ;;  %v1989_v47 = vpack.c.bf16 %v1275_v43, %v1275_v43  ;;  %v1141_v49 = vmul.f32 %v2831_v15, %v933_v45  ;;  %v1173_v50 = vmul.f32 %v2831_v15, %v1061_v46  ;;  %v935_v51 = vpop.f32.mrb[37].mxu0  ;;  %v1063_v52 = vpop.f32.mrb[37].mxu1 }
 0x1ce   : > { %v2021_v48 = vpack.c.bf16 %v1307_v44, %v1307_v44  ;;  %v936_v53 = vpop.f32.mrb[38].mxu0  ;;  %v1064_v54 = vpop.f32.mrb[38].mxu1 }
 0x1cf   : > { %1596 = vst.msk [vmem:[%s2844_s25 + $0x44] sm:$0xf] %vm1578_vm3, %v1989_v47  ;;  %v1212_v55 = vadd.f32 %v2833_v17, %v1141_v49  ;;  %v1244_v56 = vadd.f32 %v2833_v17, %v1173_v50  ;;  %v1142_v57 = vmul.f32 %v2831_v15, %v936_v53  ;;  %v1174_v58 = vmul.f32 %v2831_v15, %v1064_v54  ;;  %v938_v59 = vpop.f32.mrb[39].mxu0  ;;  %v1066_v60 = vpop.f32.mrb[39].mxu1 }
 0x1d0   : > { %1628 = vst.msk [vmem:[%s2844_s25 + $0xc4] sm:$0xf] %vm1578_vm3, %v2021_v48 }
 0x1d1   : > { %v1276_v61 = vmax.f32 %v1212_v55, 0.0  ;;  %v1308_v62 = vmax.f32 %v1244_v56, 0.0  ;;  %v1213_v63 = vadd.f32 %v2833_v17, %v1142_v57  ;;  %v1245_v0 = vadd.f32 %v2833_v17, %v1174_v58 }
 0x1d3   : > { %v1990_v1 = vpack.c.bf16 %v1276_v61, %v1276_v61  ;;  %v2022_v2 = vpack.c.bf16 %v1308_v62, %v1308_v62  ;;  %v1277_v3 = vmax.f32 %v1213_v63, 0.0  ;;  %v1309_v4 = vmax.f32 %v1245_v0, 0.0 }
 0x1d4   : > { %v941_v5 = vpop.f32.mrb[40].mxu0  ;;  %v1069_v6 = vpop.f32.mrb[40].mxu1 }
 0x1d5   : > { %1597 = vst.msk [vmem:[%s2844_s25 + $0x48] sm:$0xf] %vm1578_vm3, %v1990_v1  ;;  %1629 = vst.msk [vmem:[%s2844_s25 + $0xc8] sm:$0xf] %vm1578_vm3, %v2022_v2  ;;  %v1991_v7 = vpack.c.bf16 %v1277_v3, %v1277_v3  ;;  %v2023_v8 = vpack.c.bf16 %v1309_v4, %v1309_v4  ;;  %v1143_v9 = vmul.f32 %v2831_v15, %v941_v5  ;;  %v943_v11 = vpop.f32.mrb[41].mxu0  ;;  %v1071_v12 = vpop.f32.mrb[41].mxu1 }
 0x1d6   : > { %v1175_v10 = vmul.f32 %v2831_v15, %v1069_v6  ;;  %v944_v13 = vpop.f32.mrb[42].mxu0  ;;  %v1072_v14 = vpop.f32.mrb[42].mxu1 }
 0x1d7   : > { %1598 = vst.msk [vmem:[%s2844_s25 + $0x4c] sm:$0xf] %vm1578_vm3, %v1991_v7  ;;  %1630 = vst.msk [vmem:[%s2844_s25 + $0xcc] sm:$0xf] %vm1578_vm3, %v2023_v8  ;;  %v1214_v16 = vadd.f32 %v2833_v17, %v1143_v9  ;;  %v1144_v19 = vmul.f32 %v2831_v15, %v944_v13  ;;  %v1176_v20 = vmul.f32 %v2831_v15, %v1072_v14  ;;  %v946_v21 = vpop.f32.mrb[43].mxu0  ;;  %v1074_v22 = vpop.f32.mrb[43].mxu1 }
 0x1d8   : > { %v1246_v18 = vadd.f32 %v2833_v17, %v1175_v10 }
 0x1d9   : > { %v1278_v23 = vmax.f32 %v1214_v16, 0.0  ;;  %v1215_v25 = vadd.f32 %v2833_v17, %v1144_v19  ;;  %v1247_v26 = vadd.f32 %v2833_v17, %v1176_v20 }
 0x1da   : > { %v1310_v24 = vmax.f32 %v1246_v18, 0.0 }
 0x1db   : > { %v1992_v27 = vpack.c.bf16 %v1278_v23, %v1278_v23  ;;  %v1279_v29 = vmax.f32 %v1215_v25, 0.0  ;;  %v1311_v30 = vmax.f32 %v1247_v26, 0.0 }
 0x1dc   : > { %v2024_v28 = vpack.c.bf16 %v1310_v24, %v1310_v24  ;;  %v949_v31 = vpop.f32.mrb[44].mxu0  ;;  %v1077_v32 = vpop.f32.mrb[44].mxu1 }
 0x1dd   : > { %1599 = vst.msk [vmem:[%s2844_s25 + $0x50] sm:$0xf] %vm1578_vm3, %v1992_v27  ;;  %v1993_v33 = vpack.c.bf16 %v1279_v29, %v1279_v29  ;;  %v2025_v34 = vpack.c.bf16 %v1311_v30, %v1311_v30  ;;  %v1145_v35 = vmul.f32 %v2831_v15, %v949_v31  ;;  %v1177_v36 = vmul.f32 %v2831_v15, %v1077_v32  ;;  %v951_v37 = vpop.f32.mrb[45].mxu0  ;;  %v1079_v38 = vpop.f32.mrb[45].mxu1 }
 0x1de   : > { %1631 = vst.msk [vmem:[%s2844_s25 + $0xd0] sm:$0xf] %vm1578_vm3, %v2024_v28  ;;  %v952_v39 = vpop.f32.mrb[46].mxu0  ;;  %v1080_v40 = vpop.f32.mrb[46].mxu1 }
 0x1df   : > { %1600 = vst.msk [vmem:[%s2844_s25 + $0x54] sm:$0xf] %vm1578_vm3, %v1993_v33  ;;  %1632 = vst.msk [vmem:[%s2844_s25 + $0xd4] sm:$0xf] %vm1578_vm3, %v2025_v34  ;;  %v1216_v41 = vadd.f32 %v2833_v17, %v1145_v35  ;;  %v1248_v42 = vadd.f32 %v2833_v17, %v1177_v36  ;;  %v1146_v43 = vmul.f32 %v2831_v15, %v952_v39  ;;  %v954_v45 = vpop.f32.mrb[47].mxu0  ;;  %v1082_v46 = vpop.f32.mrb[47].mxu1 }
 0x1e0   : > { %v1178_v44 = vmul.f32 %v2831_v15, %v1080_v40 }
 0x1e1   : > { %v1280_v47 = vmax.f32 %v1216_v41, 0.0  ;;  %v1312_v48 = vmax.f32 %v1248_v42, 0.0  ;;  %v1217_v49 = vadd.f32 %v2833_v17, %v1146_v43 }
 0x1e2   : > { %v1249_v50 = vadd.f32 %v2833_v17, %v1178_v44 }
 0x1e3   : > { %v1994_v51 = vpack.c.bf16 %v1280_v47, %v1280_v47  ;;  %v2026_v52 = vpack.c.bf16 %v1312_v48, %v1312_v48  ;;  %v1281_v53 = vmax.f32 %v1217_v49, 0.0 }
 0x1e4   : > { %v1313_v54 = vmax.f32 %v1249_v50, 0.0  ;;  %v957_v55 = vpop.f32.mrb[48].mxu0  ;;  %v1085_v56 = vpop.f32.mrb[48].mxu1 }
 0x1e5   : > { %1601 = vst.msk [vmem:[%s2844_s25 + $0x58] sm:$0xf] %vm1578_vm3, %v1994_v51  ;;  %1633 = vst.msk [vmem:[%s2844_s25 + $0xd8] sm:$0xf] %vm1578_vm3, %v2026_v52  ;;  %v1995_v57 = vpack.c.bf16 %v1281_v53, %v1281_v53  ;;  %v1147_v59 = vmul.f32 %v2831_v15, %v957_v55  ;;  %v1179_v60 = vmul.f32 %v2831_v15, %v1085_v56  ;;  %v959_v61 = vpop.f32.mrb[49].mxu0  ;;  %v1087_v62 = vpop.f32.mrb[49].mxu1 }
 0x1e6   : > { %v2027_v58 = vpack.c.bf16 %v1313_v54, %v1313_v54  ;;  %v960_v63 = vpop.f32.mrb[50].mxu0  ;;  %v1088_v0 = vpop.f32.mrb[50].mxu1 }
 0x1e7   : > { %1602 = vst.msk [vmem:[%s2844_s25 + $0x5c] sm:$0xf] %vm1578_vm3, %v1995_v57  ;;  %v1218_v1 = vadd.f32 %v2833_v17, %v1147_v59  ;;  %v1250_v2 = vadd.f32 %v2833_v17, %v1179_v60  ;;  %v1148_v3 = vmul.f32 %v2831_v15, %v960_v63  ;;  %v1180_v4 = vmul.f32 %v2831_v15, %v1088_v0  ;;  %v962_v5 = vpop.f32.mrb[51].mxu0  ;;  %v1090_v6 = vpop.f32.mrb[51].mxu1 }
 0x1e8   : > { %1634 = vst.msk [vmem:[%s2844_s25 + $0xdc] sm:$0xf] %vm1578_vm3, %v2027_v58 }
 0x1e9   : > { %v1282_v7 = vmax.f32 %v1218_v1, 0.0  ;;  %v1314_v8 = vmax.f32 %v1250_v2, 0.0  ;;  %v1219_v9 = vadd.f32 %v2833_v17, %v1148_v3  ;;  %v1251_v10 = vadd.f32 %v2833_v17, %v1180_v4 }
 0x1eb   : > { %v1996_v11 = vpack.c.bf16 %v1282_v7, %v1282_v7  ;;  %v2028_v12 = vpack.c.bf16 %v1314_v8, %v1314_v8  ;;  %v1283_v13 = vmax.f32 %v1219_v9, 0.0  ;;  %v1315_v14 = vmax.f32 %v1251_v10, 0.0 }
 0x1ec   : > { %v965_v16 = vpop.f32.mrb[52].mxu0  ;;  %v1093_v18 = vpop.f32.mrb[52].mxu1 }
 0x1ed   : > { %1603 = vst.msk [vmem:[%s2844_s25 + $0x60] sm:$0xf] %vm1578_vm3, %v1996_v11  ;;  %1635 = vst.msk [vmem:[%s2844_s25 + $0xe0] sm:$0xf] %vm1578_vm3, %v2028_v12  ;;  %v1997_v19 = vpack.c.bf16 %v1283_v13, %v1283_v13  ;;  %v2029_v20 = vpack.c.bf16 %v1315_v14, %v1315_v14  ;;  %v1149_v21 = vmul.f32 %v2831_v15, %v965_v16  ;;  %v967_v23 = vpop.f32.mrb[53].mxu0  ;;  %v1095_v24 = vpop.f32.mrb[53].mxu1 }
 0x1ee   : > { %v1181_v22 = vmul.f32 %v2831_v15, %v1093_v18  ;;  %v968_v25 = vpop.f32.mrb[54].mxu0  ;;  %v1096_v26 = vpop.f32.mrb[54].mxu1 }
 0x1ef   : > { %1604 = vst.msk [vmem:[%s2844_s25 + $0x64] sm:$0xf] %vm1578_vm3, %v1997_v19  ;;  %1636 = vst.msk [vmem:[%s2844_s25 + $0xe4] sm:$0xf] %vm1578_vm3, %v2029_v20  ;;  %v1220_v27 = vadd.f32 %v2833_v17, %v1149_v21  ;;  %v1150_v29 = vmul.f32 %v2831_v15, %v968_v25  ;;  %v1182_v30 = vmul.f32 %v2831_v15, %v1096_v26  ;;  %v970_v31 = vpop.f32.mrb[55].mxu0  ;;  %v1098_v32 = vpop.f32.mrb[55].mxu1 }
 0x1f0   : > { %v1252_v28 = vadd.f32 %v2833_v17, %v1181_v22 }
 0x1f1   : > { %v1284_v33 = vmax.f32 %v1220_v27, 0.0  ;;  %v1221_v35 = vadd.f32 %v2833_v17, %v1150_v29  ;;  %v1253_v36 = vadd.f32 %v2833_v17, %v1182_v30 }
 0x1f2   : > { %v1316_v34 = vmax.f32 %v1252_v28, 0.0 }
 0x1f3   : > { %v1998_v37 = vpack.c.bf16 %v1284_v33, %v1284_v33  ;;  %v1285_v39 = vmax.f32 %v1221_v35, 0.0  ;;  %v1317_v40 = vmax.f32 %v1253_v36, 0.0 }
 0x1f4   : > { %v2030_v38 = vpack.c.bf16 %v1316_v34, %v1316_v34  ;;  %v973_v41 = vpop.f32.mrb[56].mxu0  ;;  %v1101_v42 = vpop.f32.mrb[56].mxu1 }
 0x1f5   : > { %1605 = vst.msk [vmem:[%s2844_s25 + $0x68] sm:$0xf] %vm1578_vm3, %v1998_v37  ;;  %v1999_v43 = vpack.c.bf16 %v1285_v39, %v1285_v39  ;;  %v2031_v44 = vpack.c.bf16 %v1317_v40, %v1317_v40  ;;  %v1151_v45 = vmul.f32 %v2831_v15, %v973_v41  ;;  %v1183_v46 = vmul.f32 %v2831_v15, %v1101_v42  ;;  %v975_v47 = vpop.f32.mrb[57].mxu0  ;;  %v1103_v48 = vpop.f32.mrb[57].mxu1 }
 0x1f6   : > { %1637 = vst.msk [vmem:[%s2844_s25 + $0xe8] sm:$0xf] %vm1578_vm3, %v2030_v38  ;;  %v976_v49 = vpop.f32.mrb[58].mxu0  ;;  %v1104_v50 = vpop.f32.mrb[58].mxu1 }
 0x1f7   : > { %1606 = vst.msk [vmem:[%s2844_s25 + $0x6c] sm:$0xf] %vm1578_vm3, %v1999_v43  ;;  %1638 = vst.msk [vmem:[%s2844_s25 + $0xec] sm:$0xf] %vm1578_vm3, %v2031_v44  ;;  %v1222_v51 = vadd.f32 %v2833_v17, %v1151_v45  ;;  %v1254_v52 = vadd.f32 %v2833_v17, %v1183_v46  ;;  %v1152_v53 = vmul.f32 %v2831_v15, %v976_v49  ;;  %v978_v55 = vpop.f32.mrb[59].mxu0  ;;  %v1106_v56 = vpop.f32.mrb[59].mxu1 }
 0x1f8   : > { %v1184_v54 = vmul.f32 %v2831_v15, %v1104_v50 }
 0x1f9   : > { %v1286_v57 = vmax.f32 %v1222_v51, 0.0  ;;  %v1318_v58 = vmax.f32 %v1254_v52, 0.0  ;;  %v1223_v59 = vadd.f32 %v2833_v17, %v1152_v53 }
 0x1fa   : > { %v1255_v60 = vadd.f32 %v2833_v17, %v1184_v54 }
 0x1fb   : > { %v2000_v61 = vpack.c.bf16 %v1286_v57, %v1286_v57  ;;  %v2032_v62 = vpack.c.bf16 %v1318_v58, %v1318_v58  ;;  %v1287_v63 = vmax.f32 %v1223_v59, 0.0 }
 0x1fc   : > { %v1319_v0 = vmax.f32 %v1255_v60, 0.0  ;;  %v981_v1 = vpop.f32.mrb[60].mxu0  ;;  %v1109_v2 = vpop.f32.mrb[60].mxu1 }
 0x1fd   : > { %1607 = vst.msk [vmem:[%s2844_s25 + $0x70] sm:$0xf] %vm1578_vm3, %v2000_v61  ;;  %1639 = vst.msk [vmem:[%s2844_s25 + $0xf0] sm:$0xf] %vm1578_vm3, %v2032_v62  ;;  %v2001_v3 = vpack.c.bf16 %v1287_v63, %v1287_v63  ;;  %v1153_v5 = vmul.f32 %v2831_v15, %v981_v1  ;;  %v1185_v6 = vmul.f32 %v2831_v15, %v1109_v2  ;;  %v983_v7 = vpop.f32.mrb[61].mxu0  ;;  %v1111_v8 = vpop.f32.mrb[61].mxu1 }
 0x1fe   : > { %v2033_v4 = vpack.c.bf16 %v1319_v0, %v1319_v0  ;;  %v984_v9 = vpop.f32.mrb[62].mxu0  ;;  %v1112_v10 = vpop.f32.mrb[62].mxu1 }
 0x1ff   : > { %1608 = vst.msk [vmem:[%s2844_s25 + $0x74] sm:$0xf] %vm1578_vm3, %v2001_v3  ;;  %v1224_v11 = vadd.f32 %v2833_v17, %v1153_v5  ;;  %v1256_v12 = vadd.f32 %v2833_v17, %v1185_v6  ;;  %v1154_v13 = vmul.f32 %v2831_v15, %v984_v9  ;;  %v1186_v14 = vmul.f32 %v2831_v15, %v1112_v10  ;;  %v986_v16 = vpop.f32.mrb[63].mxu0  ;;  %v1114_v18 = vpop.f32.mrb[63].mxu1 }
 0x200   : > { %1640 = vst.msk [vmem:[%s2844_s25 + $0xf4] sm:$0xf] %vm1578_vm3, %v2033_v4 }
 0x201   : > { %v1288_v19 = vmax.f32 %v1224_v11, 0.0  ;;  %v1320_v20 = vmax.f32 %v1256_v12, 0.0  ;;  %v1225_v21 = vadd.f32 %v2833_v17, %v1154_v13  ;;  %v1257_v22 = vadd.f32 %v2833_v17, %v1186_v14 }
 0x203   : > { %v2002_v23 = vpack.c.bf16 %v1288_v19, %v1288_v19  ;;  %v2034_v24 = vpack.c.bf16 %v1320_v20, %v1320_v20  ;;  %v1289_v25 = vmax.f32 %v1225_v21, 0.0  ;;  %v1321_v26 = vmax.f32 %v1257_v22, 0.0 }
 0x205   : > { %1609 = vst.msk [vmem:[%s2844_s25 + $0x78] sm:$0xf] %vm1578_vm3, %v2002_v23  ;;  %1641 = vst.msk [vmem:[%s2844_s25 + $0xf8] sm:$0xf] %vm1578_vm3, %v2034_v24  ;;  %v2003_v15 = vpack.c.bf16 %v1289_v25, %v1289_v25  ;;  %v2035_v17 = vpack.c.bf16 %v1321_v26, %v1321_v26 }
 0x207   : > { %1610 = vst.msk [vmem:[%s2844_s25 + $0x7c] sm:$0xf] %vm1578_vm3, %v2003_v15  ;;  %1642 = vst.msk [vmem:[%s2844_s25 + $0xfc] sm:$0xf] %vm1578_vm3, %v2035_v17 }
 0x208   : > { %2391 = shalt.err (!%p2388_p13)
}
 0x209   : > { %s2392_s29 = scalar_lea.hbm %s3091_s6, 4096  ;;  %s2396_s8 = scalar_lea.hbm %s3153_s4, 24576 }
 0x20a   : > { %p2393_p4 = scmp.ne.s32.totalorder %s3091_s6, %s2392_s29  ;;  %p2397_p11 = scmp.lt.u32.totalorder %s3091_s6, %s3153_s4 }
 0x20b   : > { %p2398_p1 = scmp.lt.u32.totalorder %s2396_s8, %s2392_s29  ;;  %p2400_p12 = scmp.lt.u32.totalorder %s2392_s29, %s3091_s6 }
 0x20c   : > { %p2394_p2 = pnand %p2393_p4, %p2659_p0 }
 0x20d   : > { %p2399_p10 = por %p2398_p1, %p2397_p11 }
 0x20e   : > { %p2395_p8 = pneg %p2394_p2 }
 0x20f   : > { %p2401_p6 = por %p2400_p12, %p2399_p10 }
 0x211   : > { %p2402_p3 = pnand %p2401_p6, %p2395_p8 }
 0x213   : > { %2405 = shalt.err (!%p2402_p3)
}
 0x214   : > { %s2481_s25 = smov 64   ;;  %s2482_s27 = smov 4  }
 0x215   : > { %2071 = dma.vmem_to_hbm [thread:$0]  (%p2659_p0), %s3093_s24, 4096, %s3091_s6, %s1644_s18, %s2481_s25, %s2481_s25, %s2482_s27  }
 0x216 PF: > { %s3173_s22 = sld [smem:[#allocation15_spill]]  ;;  %p2098_p5 = scmp.ge.s32.totalorder %s2468_s20, 2 }
 0x217   : > { %s1673_s28 = sand.u32 1, %s2448_s15  }
 0x218   : > { %s1674_s7 = scalar_lea.sflag [#allocation4], %s1673_s28 }
 0x21c   : > { %p3174_p7 = scmp.ne.s32.totalorder %s3173_s22, 0 }
 0x21e   : > { %p2088_p9 = pnand %p2098_p5, %p3174_p7 }
 0x220   : > { %2443 = dma.done.wait (!%p2088_p9), %s1674_s7, 4096  }
 0x221   : > { %2445 = vsyncadd (!%p2088_p9), %s1674_s7, 4294963200  ;;  %s22_s20 = sadd.s32 1, %s2468_s20   ;;  %s3175_s15 = smov %s2452_s16 }
 0x222   : > { %p19_p13 = scmp.ge.s32.totalorder %s22_s20, 8   ;;  %s3176_s16 = smov %s2456_s17 }
 0x223   : > { %s3177_s17 = smov %s2671_s11  ;;  %s3178_s18 = smov %s2464_s19 }
 0x224   : > { %s3179_s19 = smov %s3181_s26  ;;  %21 = sbr.rel (!%p19_p13) target bundleno = 8 (0x8), region = 96 }
 0x22b   :  { %1679 = vsyncpa [#allocation3], 1 }
 0x22c   :  { %1681 = vsyncpa [#allocation3 + $0x1], 1 }
 0x22d   :  { %1682 = vsyncpa [#allocation6], 1 }
 0x22e   :  { %1683 = vsyncpa [#allocation9], 1 }
 0x22f   :  { %1684 = vsyncpa [#allocation4], 1 }
 0x230   :  { %1686 = vsyncpa [#allocation4 + $0x1], 1 }

</bundles_post_ra>
